<compile_context>
chip_gen: v7x
topology: tpu7x:2x2x1
jax: 0.10.0
libtpu: 0.0.40
codegen_flags: <defaults>
</compile_context>

<pallas_src>
import functools
import math

import jax
import jax.numpy as jnp
from jax.experimental import pallas as pl
from jax.experimental.pallas import tpu as pltpu


# ----------------------------- config / constants ---------------------------

ACT_DTYPE = jnp.bfloat16          # storage dtype for weights / activations
VMEM_LIMIT = 32 * 1024 * 1024     # fits v5e/v6e and v7x (64 MiB physical) alike


def _pick_tile(dim, pref):
    """Largest power-of-two-ish tile <= pref that divides dim (or the full dim)."""
    if dim <= pref:
        return dim
    t = pref
    while dim % t:
        t //= 2
        if t < 8:
            return dim
    return t


# ----------------------------- Pallas kernels ------------------------------

def _linear_kernel(x_ref, w_ref, b_ref, o_ref, *, activation):
    """Matmul (full K per step) + bias (+ fused activation). Grid = (M/tm, N/tn)."""
    # x/w are bf16 in HBM already -> no in-kernel down-cast, f32 accumulation.
    y = jnp.dot(x_ref[...], w_ref[...], preferred_element_type=jnp.float32)
    y = y + b_ref[...].astype(jnp.float32)
    if activation == "gelu":
        # tanh-approximation GELU in f32 (v5e has no bf16 VPU/EUP).
        # TODO(synk): exact erf-GELU if bit-parity with torch GELU is required.
        y = 0.5 * y * (1.0 + jnp.tanh(
            0.7978845608028654 * (y + 0.044715 * y * y * y)))
    elif activation == "tanh":
        y = jnp.tanh(y)
    o_ref[...] = y.astype(o_ref.dtype)


def _linear_res_ln_kernel(x_ref, w_ref, b_ref, r_ref, g_ref, bln_ref, o_ref, *, eps):
    """Linear (full K, full N) + residual add + LayerNorm fused. Grid = (M/tm,)."""
    y = jnp.dot(x_ref[...], w_ref[...], preferred_element_type=jnp.float32)
    y = y + b_ref[...].astype(jnp.float32) + r_ref[...].astype(jnp.float32)
    mu = jnp.mean(y, axis=-1, keepdims=True)
    var = jnp.mean((y - mu) ** 2, axis=-1, keepdims=True)
    y = (y - mu) * jax.lax.rsqrt(var + eps)
    o_ref[...] = (y * g_ref[...].astype(jnp.float32)
                  + bln_ref[...].astype(jnp.float32)).astype(o_ref.dtype)


def _layernorm_kernel(x_ref, g_ref, b_ref, o_ref, *, eps):
    """Standalone LayerNorm over the last dim (embedding LN)."""
    x = x_ref[...].astype(jnp.float32)
    mu = jnp.mean(x, axis=-1, keepdims=True)
    var = jnp.mean((x - mu) ** 2, axis=-1, keepdims=True)
    y = (x - mu) * jax.lax.rsqrt(var + eps)
    o_ref[...] = (y * g_ref[...].astype(jnp.float32)
                  + b_ref[...].astype(jnp.float32)).astype(o_ref.dtype)


def _flash_attn_kernel(q_ref, k_ref, v_ref, bias_ref, o_ref,
                       m_sc, l_sc, acc_sc, *, scale):
    """Flash-style attention. Grid = (B, nH, S/tq, S/tkv); kv axis is a reduction."""
    ki = pl.program_id(3)

    @pl.when(ki == 0)
    def _init():
        m_sc[...] = jnp.full(m_sc.shape, -jnp.inf, dtype=m_sc.dtype)
        l_sc[...] = jnp.zeros(l_sc.shape, dtype=l_sc.dtype)
        acc_sc[...] = jnp.zeros(acc_sc.shape, dtype=acc_sc.dtype)

    q = q_ref[0, 0]                                   # (tq, Dh) bf16
    k = k_ref[0, 0]                                   # (tkv, Dh) bf16
    v = v_ref[0, 0]                                   # (tkv, Dh) bf16

    # Contract last dims directly -> MXU without an XLU transpose of k.
    s = jax.lax.dot_general(
        q, k, dimension_numbers=(((1,), (1,)), ((), ())),
        preferred_element_type=jnp.float32) * scale   # (tq, tkv) f32
    s = s + bias_ref[0]                               # (1, tkv) bcast over q rows

    m_prev = m_sc[...]
    m_new = jnp.maximum(m_prev, jnp.max(s, axis=-1, keepdims=True))
    alpha = jnp.exp(m_prev - m_new)
    p = jnp.exp(s - m_new)
    l_sc[...] = alpha * l_sc[...] + jnp.sum(p, axis=-1, keepdims=True)
    acc_sc[...] = alpha * acc_sc[...] + jnp.dot(
        p.astype(v.dtype), v, preferred_element_type=jnp.float32)
    m_sc[...] = m_new

    @pl.when(ki == pl.num_programs(3) - 1)
    def _finalize():
        inv_l = pl.reciprocal(l_sc[...], approx=True)   # EUP slot, not VALU divide
        o_ref[0, 0] = (acc_sc[...] * inv_l).astype(o_ref.dtype)


def _head_kernel(cls_ref, w1_ref, b1_ref, w2_ref, b2_ref, o_ref):
    """Fused pooler (tanh) + classifier for the CLS rows."""
    pooled = jnp.tanh(
        jnp.dot(cls_ref[...], w1_ref[...], preferred_element_type=jnp.float32)
        + b1_ref[...].astype(jnp.float32))
    logits = jnp.dot(pooled.astype(w2_ref.dtype), w2_ref[...],
                     preferred_element_type=jnp.float32) + b2_ref[...].astype(jnp.float32)
    o_ref[...] = logits.astype(o_ref.dtype)


# ----------------------------- Pallas wrappers ------------------------------

def pallas_linear(x, w, b, activation=None, out_dtype=None, *,
                  tm_pref=512, tn_pref=512):
    M, K = x.shape
    _, N = w.shape
    out_dtype = out_dtype if out_dtype is not None else x.dtype
    tm = _pick_tile(M, tm_pref)
    tn = _pick_tile(N, tn_pref)
    grid = (M // tm, N // tn)
    return pl.pallas_call(
        functools.partial(_linear_kernel, activation=activation),
        out_shape=jax.ShapeDtypeStruct((M, N), out_dtype),
        grid=grid,
        in_specs=[pl.BlockSpec((tm, K), lambda i, j: (i, 0)),
                  pl.BlockSpec((K, tn), lambda i, j: (0, j)),
                  pl.BlockSpec((1, tn), lambda i, j: (0, j))],
        out_specs=pl.BlockSpec((tm, tn), lambda i, j: (i, j)),
        compiler_params=pltpu.CompilerParams(
            dimension_semantics=("parallel", "parallel"),
            vmem_limit_bytes=VMEM_LIMIT),
    )(x, w, b.reshape(1, N))


def pallas_linear_residual_ln(x, w, b, residual, gamma, beta, *,
                              eps=1e-12, out_dtype=None, tm_pref=512):
    """Linear projection with fused residual-add + LayerNorm epilogue (tn == N)."""
    M, K = x.shape
    _, N = w.shape
    out_dtype = out_dtype if out_dtype is not None else residual.dtype
    tm = _pick_tile(M, tm_pref)
    grid = (M // tm,)
    return pl.pallas_call(
        functools.partial(_linear_res_ln_kernel, eps=eps),
        out_shape=jax.ShapeDtypeStruct((M, N), out_dtype),
        grid=grid,
        in_specs=[pl.BlockSpec((tm, K), lambda i: (i, 0)),
                  pl.BlockSpec((K, N), lambda i: (0, 0)),
                  pl.BlockSpec((1, N), lambda i: (0, 0)),
                  pl.BlockSpec((tm, N), lambda i: (i, 0)),
                  pl.BlockSpec((1, N), lambda i: (0, 0)),
                  pl.BlockSpec((1, N), lambda i: (0, 0))],
        out_specs=pl.BlockSpec((tm, N), lambda i: (i, 0)),
        compiler_params=pltpu.CompilerParams(
            dimension_semantics=("parallel",),
            vmem_limit_bytes=VMEM_LIMIT),
    )(x, w, b.reshape(1, N), residual, gamma.reshape(1, N), beta.reshape(1, N))


def pallas_layernorm(x, gamma, beta, *, eps=1e-12, out_dtype=None, tm_pref=512):
    M, H = x.shape
    out_dtype = out_dtype if out_dtype is not None else x.dtype
    tm = _pick_tile(M, tm_pref)
    grid = (M // tm,)
    return pl.pallas_call(
        functools.partial(_layernorm_kernel, eps=eps),
        out_shape=jax.ShapeDtypeStruct((M, H), out_dtype),
        grid=grid,
        in_specs=[pl.BlockSpec((tm, H), lambda i: (i, 0)),
                  pl.BlockSpec((1, H), lambda i: (0, 0)),
                  pl.BlockSpec((1, H), lambda i: (0, 0))],
        out_specs=pl.BlockSpec((tm, H), lambda i: (i, 0)),
        compiler_params=pltpu.CompilerParams(
            dimension_semantics=("parallel",),
            vmem_limit_bytes=VMEM_LIMIT),
    )(x, gamma.reshape(1, H), beta.reshape(1, H))


def pallas_flash_attention(q, k, v, mask_bias, *, scale, tq_pref=128, tkv_pref=128):
    """q/k/v: (B, nH, S, Dh) bf16; mask_bias: (B, 1, S) f32 additive bias."""
    B, nH, S, Dh = q.shape
    tq = _pick_tile(S, tq_pref)
    tkv = _pick_tile(S, tkv_pref)
    grid = (B, nH, S // tq, S // tkv)
    return pl.pallas_call(
        functools.partial(_flash_attn_kernel, scale=scale),
        out_shape=jax.ShapeDtypeStruct((B, nH, S, Dh), q.dtype),
        grid=grid,
        in_specs=[pl.BlockSpec((1, 1, tq, Dh), lambda b, h, qi, ki: (b, h, qi, 0)),
                  pl.BlockSpec((1, 1, tkv, Dh), lambda b, h, qi, ki: (b, h, ki, 0)),
                  pl.BlockSpec((1, 1, tkv, Dh), lambda b, h, qi, ki: (b, h, ki, 0)),
                  pl.BlockSpec((1, 1, tkv), lambda b, h, qi, ki: (b, 0, ki))],
        out_specs=pl.BlockSpec((1, 1, tq, Dh), lambda b, h, qi, ki: (b, h, qi, 0)),
        scratch_shapes=[pltpu.VMEM((tq, 1), jnp.float32),    # running max
                        pltpu.VMEM((tq, 1), jnp.float32),    # running sum
                        pltpu.VMEM((tq, Dh), jnp.float32)],  # context accumulator
        compiler_params=pltpu.CompilerParams(
            dimension_semantics=("parallel", "parallel", "parallel", "arbitrary"),
            vmem_limit_bytes=VMEM_LIMIT),
    )(q, k, v, mask_bias)


def pallas_pooler_classifier(cls, w1, b1, w2, b2):
    B, H = cls.shape
    C = w2.shape[1]
    return pl.pallas_call(
        _head_kernel,
        out_shape=jax.ShapeDtypeStruct((B, C), jnp.float32),
    )(cls, w1, b1.reshape(1, H), w2, b2.reshape(1, C))


# ----------------------------- Model definition -----------------------------

CFG = dict(
    vocab_size=100,
    max_position=64,
    type_vocab=2,
    hidden_size=32,
    num_heads=2,
    num_layers=2,
    intermediate_size=128,
    num_classes=3,
)


def init_params(key, cfg):
    """Weights / embeddings stored as bf16; biases and LN params kept f32."""
    H, I = cfg["hidden_size"], cfg["intermediate_size"]
    std = 0.02

    def dense(k, din, dout):
        return {"w": (jax.random.normal(k, (din, dout), jnp.float32) * std).astype(ACT_DTYPE),
                "b": jnp.zeros((dout,), jnp.float32)}

    n_keys = 5 + 4 * cfg["num_layers"]
    ki = iter(jax.random.split(key, n_keys))

    params = {
        "word_emb": (jax.random.normal(next(ki), (cfg["vocab_size"], H), jnp.float32) * std).astype(ACT_DTYPE),
        "pos_emb": (jax.random.normal(next(ki), (cfg["max_position"], H), jnp.float32) * std).astype(ACT_DTYPE),
        "type_emb": (jax.random.normal(next(ki), (cfg["type_vocab"], H), jnp.float32) * std).astype(ACT_DTYPE),
        "emb_ln_g": jnp.ones((H,), jnp.float32),
        "emb_ln_b": jnp.zeros((H,), jnp.float32),
        "layers": [],
        "pooler": dense(next(ki), H, H),
        "fc": dense(next(ki), H, cfg["num_classes"]),
    }
    for _ in range(cfg["num_layers"]):
        layer = {
            # Fused Q|K|V projection weights: one (H, 3H) matmul per layer.
            "qkv_w": (jax.random.normal(next(ki), (H, 3 * H), jnp.float32) * std).astype(ACT_DTYPE),
            "qkv_b": jnp.zeros((3 * H,), jnp.float32),
            "attn_out": dense(next(ki), H, H),
            "attn_ln_g": jnp.ones((H,), jnp.float32),
            "attn_ln_b": jnp.zeros((H,), jnp.float32),
            "inter": dense(next(ki), H, I),
            "out": dense(next(ki), I, H),
            "out_ln_g": jnp.ones((H,), jnp.float32),
            "out_ln_b": jnp.zeros((H,), jnp.float32),
        }
        params["layers"].append(layer)
    return params


def bert_classifier_forward(params, context, token_type_ids, attention_mask, cfg):
    B, S = context.shape
    H = cfg["hidden_size"]
    nH = cfg["num_heads"]
    Dh = H // nH
    scale = 1.0 / math.sqrt(Dh)

    # --- embeddings (gathers are plain-JAX glue; sum in f32 for precision) ---
    emb = (jnp.take(params["word_emb"], context, axis=0).astype(jnp.float32)
           + params["pos_emb"][None, :S, :].astype(jnp.float32)
           + jnp.take(params["type_emb"], token_type_ids, axis=0).astype(jnp.float32))
    hidden = pallas_layernorm(emb.reshape(B * S, H),
                              params["emb_ln_g"], params["emb_ln_b"],
                              out_dtype=ACT_DTYPE)                     # (B*S, H) bf16

    # --- extended attention mask: (1 - mask) * -10000, shape (B, 1, S) ---
    mask_bias = ((1.0 - attention_mask.astype(jnp.float32)) * -10000.0).reshape(B, 1, S)

    # --- encoder layers ---
    for layer in params["layers"]:
        # Fused QKV projection: one matmul -> (B*S, 3H), bf16 storage.
        qkv = pallas_linear(hidden, layer["qkv_w"], layer["qkv_b"], out_dtype=ACT_DTYPE)

        # Head split (JAX glue; lane axis must stay = Dh inside the flash kernel).
        # TODO(synk): fold this split/merge into BlockSpecs once Dh is a multiple of 128.
        qkv = qkv.reshape(B, S, 3, nH, Dh)
        q = jnp.transpose(qkv[:, :, 0], (0, 2, 1, 3))                  # (B, nH, S, Dh)
        k = jnp.transpose(qkv[:, :, 1], (0, 2, 1, 3))
        v = jnp.transpose(qkv[:, :, 2], (0, 2, 1, 3))

        ctx = pallas_flash_attention(q, k, v, mask_bias, scale=scale)  # (B, nH, S, Dh)
        ctx = jnp.transpose(ctx, (0, 2, 1, 3)).reshape(B * S, H)       # merge heads

        # Attention output projection with fused residual-add + LayerNorm.
        hidden = pallas_linear_residual_ln(
            ctx, layer["attn_out"]["w"], layer["attn_out"]["b"],
            residual=hidden, gamma=layer["attn_ln_g"], beta=layer["attn_ln_b"],
            out_dtype=ACT_DTYPE)

        # FFN: intermediate (GELU) then output projection with fused residual + LN.
        inter = pallas_linear(hidden, layer["inter"]["w"], layer["inter"]["b"],
                              activation="gelu", out_dtype=ACT_DTYPE)
        hidden = pallas_linear_residual_ln(
            inter, layer["out"]["w"], layer["out"]["b"],
            residual=hidden, gamma=layer["out_ln_g"], beta=layer["out_ln_b"],
            out_dtype=ACT_DTYPE)

    # --- fused pooler (tanh on CLS) + classifier head ---
    cls = hidden.reshape(B, S, H)[:, 0, :]
    logits = pallas_pooler_classifier(cls, params["pooler"]["w"], params["pooler"]["b"],
                                      params["fc"]["w"], params["fc"]["b"])
    return logits


# --------------------------------- main -------------------------------------

if __name__ == "__main__":
    cfg = CFG
    B, S = 2, 8

    key = jax.random.PRNGKey(0)
    k_param, k_ids = jax.random.split(key, 2)

    params = init_params(k_param, cfg)

    context = jax.random.randint(k_ids, (B, S), 0, cfg["vocab_size"], dtype=jnp.int32)
    seq_len = jnp.full((B,), S, dtype=jnp.int32)          # unused, mirrors x[1]
    # mask: first sequence fully valid, second has last 3 tokens padded
    attention_mask = jnp.array(
        [[1] * S, [1] * (S - 3) + [0] * 3], dtype=jnp.int32)
    token_type_ids = jnp.zeros((B, S), dtype=jnp.int32)

    x = (context, seq_len, attention_mask)   # matches PyTorch forward's x tuple

    fwd = jax.jit(functools.partial(bert_classifier_forward, cfg=cfg))
    logits = fwd(params, x[0], token_type_ids, x[2])
    jax.block_until_ready(logits)

    assert logits.shape == (B, cfg["num_classes"])
    print("KERNEL_OK")
</pallas_src>

<mosaic_0001>
module attributes {stable_mosaic.version = 11 : i64} {
  func.func @_layernorm_kernel(%arg0: i32, %arg1: memref<16x32xf32, #tpu.memory_space<vmem>>, %arg2: memref<1x32xf32, #tpu.memory_space<vmem>>, %arg3: memref<1x32xf32, #tpu.memory_space<vmem>>, %arg4: memref<16x32xbf16, #tpu.memory_space<vmem>>) attributes {dimension_semantics = [#tpu.dimension_semantics<parallel>], iteration_bounds = array<i64: 1>, scalar_prefetch = 0 : i64, scratch_operands = 0 : i64, tpu.core_type = #tpu.core_type<tc>, window_params = [{transform_indices = @transform_0, window_bounds = array<i64: 16, 32>}, {pipeline_mode = #tpu.pipeline_mode<synchronous>, transform_indices = @transform_1, window_bounds = array<i64: 1, 32>}, {pipeline_mode = #tpu.pipeline_mode<synchronous>, transform_indices = @transform_2, window_bounds = array<i64: 1, 32>}, {transform_indices = @transform_3, window_bounds = array<i64: 16, 32>}]} {
    %c0 = arith.constant 0 : index
    %c0_0 = arith.constant 0 : index
    %0 = vector.load %arg1[%c0, %c0_0] : memref<16x32xf32, #tpu.memory_space<vmem>>, vector<16x32xf32>
    %cst = arith.constant dense<0.000000e+00> : vector<16xf32>
    %1 = vector.multi_reduction <add>, %0, %cst [1] : vector<16x32xf32> to vector<16xf32>
    %2 = vector.shape_cast %1 : vector<16xf32> to vector<16x1xf32>
    %cst_1 = arith.constant 3.200000e+01 : f32
    %3 = vector.broadcast %cst_1 : f32 to vector<16x1xf32>
    %4 = arith.divf %2, %3 : vector<16x1xf32>
    %5 = vector.broadcast %4 : vector<16x1xf32> to vector<16x32xf32>
    %6 = arith.subf %0, %5 : vector<16x32xf32>
    %7 = arith.mulf %6, %6 : vector<16x32xf32>
    %cst_2 = arith.constant dense<0.000000e+00> : vector<16xf32>
    %8 = vector.multi_reduction <add>, %7, %cst_2 [1] : vector<16x32xf32> to vector<16xf32>
    %9 = vector.shape_cast %8 : vector<16xf32> to vector<16x1xf32>
    %cst_3 = arith.constant 3.200000e+01 : f32
    %10 = vector.broadcast %cst_3 : f32 to vector<16x1xf32>
    %11 = arith.divf %9, %10 : vector<16x1xf32>
    %12 = vector.broadcast %4 : vector<16x1xf32> to vector<16x32xf32>
    %13 = arith.subf %0, %12 : vector<16x32xf32>
    %cst_4 = arith.constant 9.99999996E-13 : f32
    %14 = vector.broadcast %cst_4 : f32 to vector<16x1xf32>
    %15 = arith.addf %11, %14 : vector<16x1xf32>
    %16 = math.rsqrt %15 : vector<16x1xf32>
    %17 = vector.broadcast %16 : vector<16x1xf32> to vector<16x32xf32>
    %18 = arith.mulf %13, %17 : vector<16x32xf32>
    %c0_5 = arith.constant 0 : index
    %c0_6 = arith.constant 0 : index
    %19 = vector.load %arg2[%c0_5, %c0_6] : memref<1x32xf32, #tpu.memory_space<vmem>>, vector<1x32xf32>
    %20 = vector.broadcast %19 : vector<1x32xf32> to vector<16x32xf32>
    %21 = arith.mulf %18, %20 : vector<16x32xf32>
    %c0_7 = arith.constant 0 : index
    %c0_8 = arith.constant 0 : index
    %22 = vector.load %arg3[%c0_7, %c0_8] : memref<1x32xf32, #tpu.memory_space<vmem>>, vector<1x32xf32>
    %23 = vector.broadcast %22 : vector<1x32xf32> to vector<16x32xf32>
    %24 = arith.addf %21, %23 : vector<16x32xf32>
    %25 = arith.truncf %24 : vector<16x32xf32> to vector<16x32xbf16>
    %c0_9 = arith.constant 0 : index
    %c0_10 = arith.constant 0 : index
    %26 = vector.load %arg4[%c0_9, %c0_10] : memref<16x32xbf16, #tpu.memory_space<vmem>>, vector<16x32xbf16>
    tpu.vector_store %arg4[%c0_9, %c0_10], %25 {strides = array<i32>} : memref<16x32xbf16, #tpu.memory_space<vmem>>, vector<16x32xbf16>,
    return
  }
  func.func @transform_0(%arg0: i32) -> (i32, i32) {
    %c0_i32 = arith.constant 0 : i32
    %c0_i32_0 = arith.constant 0 : i32
    return %arg0, %c0_i32 : i32, i32
  }
  func.func @transform_1(%arg0: i32) -> (i32, i32) {
    %c0_i32 = arith.constant 0 : i32
    %c0_i32_0 = arith.constant 0 : i32
    %c0_i32_1 = arith.constant 0 : i32
    return %c0_i32, %c0_i32_0 : i32, i32
  }
  func.func @transform_2(%arg0: i32) -> (i32, i32) {
    %c0_i32 = arith.constant 0 : i32
    %c0_i32_0 = arith.constant 0 : i32
    %c0_i32_1 = arith.constant 0 : i32
    return %c0_i32, %c0_i32_0 : i32, i32
  }
  func.func @transform_3(%arg0: i32) -> (i32, i32) {
    %c0_i32 = arith.constant 0 : i32
    %c0_i32_0 = arith.constant 0 : i32
    return %arg0, %c0_i32 : i32, i32
  }
}

module attributes {stable_mosaic.version = 11 : i64} {
  func.func @_linear_kernel(%arg0: i32, %arg1: i32, %arg2: memref<16x32xbf16, #tpu.memory_space<vmem>>, %arg3: memref<32x96xbf16, #tpu.memory_space<vmem>>, %arg4: memref<1x96xf32, #tpu.memory_space<vmem>>, %arg5: memref<16x96xbf16, #tpu.memory_space<vmem>>) attributes {dimension_semantics = [#tpu.dimension_semantics<parallel>, #tpu.dimension_semantics<parallel>], iteration_bounds = array<i64: 1, 1>, scalar_prefetch = 0 : i64, scratch_operands = 0 : i64, tpu.core_type = #tpu.core_type<tc>, window_params = [{transform_indices = @transform_0, window_bounds = array<i64: 16, 32>}, {transform_indices = @transform_1, window_bounds = array<i64: 32, 96>}, {transform_indices = @transform_2, window_bounds = array<i64: 1, 96>}, {transform_indices = @transform_3, window_bounds = array<i64: 16, 96>}]} {
    %c0 = arith.constant 0 : index
    %c0_0 = arith.constant 0 : index
    %0 = vector.load %arg2[%c0, %c0_0] : memref<16x32xbf16, #tpu.memory_space<vmem>>, vector<16x32xbf16>
    %c0_1 = arith.constant 0 : index
    %c0_2 = arith.constant 0 : index
    %1 = vector.load %arg3[%c0_1, %c0_2] : memref<32x96xbf16, #tpu.memory_space<vmem>>, vector<32x96xbf16>
    %cst = arith.constant dense<0.000000e+00> : vector<16x96xf32>
    %2 = tpu.matmul %0, %1, %cst {dimension_numbers = #tpu.dot_dimension_numbers<[1], [0], [0], [1], [0, 0, 1, 1], [], []>} : vector<16x32xbf16>, vector<32x96xbf16>, vector<16x96xf32> -> vector<16x96xf32>
    %c0_3 = arith.constant 0 : index
    %c0_4 = arith.constant 0 : index
    %3 = vector.load %arg4[%c0_3, %c0_4] : memref<1x96xf32, #tpu.memory_space<vmem>>, vector<1x96xf32>
    %4 = vector.broadcast %3 : vector<1x96xf32> to vector<16x96xf32>
    %5 = arith.addf %2, %4 : vector<16x96xf32>
    %6 = arith.truncf %5 : vector<16x96xf32> to vector<16x96xbf16>
    %c0_5 = arith.constant 0 : index
    %c0_6 = arith.constant 0 : index
    %7 = vector.load %arg5[%c0_5, %c0_6] : memref<16x96xbf16, #tpu.memory_space<vmem>>, vector<16x96xbf16>
    tpu.vector_store %arg5[%c0_5, %c0_6], %6 {strides = array<i32>} : memref<16x96xbf16, #tpu.memory_space<vmem>>, vector<16x96xbf16>,
    return
  }
  func.func @transform_0(%arg0: i32, %arg1: i32) -> (i32, i32) {
    %c0_i32 = arith.constant 0 : i32
    %c0_i32_0 = arith.constant 0 : i32
    return %arg0, %c0_i32 : i32, i32
  }
  func.func @transform_1(%arg0: i32, %arg1: i32) -> (i32, i32) {
    %c0_i32 = arith.constant 0 : i32
    %c0_i32_0 = arith.constant 0 : i32
    return %c0_i32, %arg1 : i32, i32
  }
  func.func @transform_2(%arg0: i32, %arg1: i32) -> (i32, i32) {
    %c0_i32 = arith.constant 0 : i32
    %c0_i32_0 = arith.constant 0 : i32
    return %c0_i32, %arg1 : i32, i32
  }
  func.func @transform_3(%arg0: i32, %arg1: i32) -> (i32, i32) {
    %c0_i32 = arith.constant 0 : i32
    return %arg0, %arg1 : i32, i32
  }
}

module attributes {stable_mosaic.version = 11 : i64} {
  func.func @_flash_attn_kernel(%arg0: i32, %arg1: i32, %arg2: i32, %arg3: i32, %arg4: memref<1x1x8x16xbf16, #tpu.memory_space<vmem>>, %arg5: memref<1x1x8x16xbf16, #tpu.memory_space<vmem>>, %arg6: memref<1x1x8x16xbf16, #tpu.memory_space<vmem>>, %arg7: memref<1x1x8xf32, #tpu.memory_space<vmem>>, %arg8: memref<1x1x8x16xbf16, #tpu.memory_space<vmem>>, %arg9: memref<8x1xf32, #tpu.memory_space<vmem>>, %arg10: memref<8x1xf32, #tpu.memory_space<vmem>>, %arg11: memref<8x16xf32, #tpu.memory_space<vmem>>) attributes {dimension_semantics = [#tpu.dimension_semantics<parallel>, #tpu.dimension_semantics<parallel>, #tpu.dimension_semantics<parallel>, #tpu.dimension_semantics<arbitrary>], iteration_bounds = array<i64: 2, 2, 1, 1>, scalar_prefetch = 0 : i64, scratch_operands = 3 : i64, tpu.core_type = #tpu.core_type<tc>, window_params = [{transform_indices = @transform_0, window_bounds = array<i64: 1, 1, 8, 16>}, {transform_indices = @transform_1, window_bounds = array<i64: 1, 1, 8, 16>}, {transform_indices = @transform_2, window_bounds = array<i64: 1, 1, 8, 16>}, {transform_indices = @transform_3, window_bounds = array<i64: 1, 1, 8>}, {transform_indices = @transform_4, window_bounds = array<i64: 1, 1, 8, 16>}]} {
    %c0_i32 = arith.constant 0 : i32
    %0 = arith.cmpi eq, %arg3, %c0_i32 : i32
    %1 = arith.extui %0 : i1 to i32
    %c0_i32_0 = arith.constant 0 : i32
    %2 = arith.cmpi ne, %1, %c0_i32_0 : i32
    scf.if %2 {
      %cst_33 = arith.constant 0xFF800000 : f32
      %42 = vector.broadcast %cst_33 : f32 to vector<8x1xf32>
      %c0_34 = arith.constant 0 : index
      %c0_35 = arith.constant 0 : index
      %43 = vector.load %arg9[%c0_34, %c0_35] : memref<8x1xf32, #tpu.memory_space<vmem>>, vector<8x1xf32>
      tpu.vector_store %arg9[%c0_34, %c0_35], %42 {strides = array<i32>} : memref<8x1xf32, #tpu.memory_space<vmem>>, vector<8x1xf32>,
      %cst_36 = arith.constant 0.000000e+00 : f32
      %44 = vector.broadcast %cst_36 : f32 to vector<8x1xf32>
      %c0_37 = arith.constant 0 : index
      %c0_38 = arith.constant 0 : index
      %45 = vector.load %arg10[%c0_37, %c0_38] : memref<8x1xf32, #tpu.memory_space<vmem>>, vector<8x1xf32>
      tpu.vector_store %arg10[%c0_37, %c0_38], %44 {strides = array<i32>} : memref<8x1xf32, #tpu.memory_space<vmem>>, vector<8x1xf32>,
      %cst_39 = arith.constant 0.000000e+00 : f32
      %46 = vector.broadcast %cst_39 : f32 to vector<8x16xf32>
      %c0_40 = arith.constant 0 : index
      %c0_41 = arith.constant 0 : index
      %47 = vector.load %arg11[%c0_40, %c0_41] : memref<8x16xf32, #tpu.memory_space<vmem>>, vector<8x16xf32>
      tpu.vector_store %arg11[%c0_40, %c0_41], %46 {strides = array<i32>} : memref<8x16xf32, #tpu.memory_space<vmem>>, vector<8x16xf32>,
    } else {
    }
    %c0 = arith.constant 0 : index
    %c0_1 = arith.constant 0 : index
    %c0_2 = arith.constant 0 : index
    %c0_3 = arith.constant 0 : index
    %3 = vector.load %arg4[%c0, %c0_1, %c0_2, %c0_3] : memref<1x1x8x16xbf16, #tpu.memory_space<vmem>>, vector<1x1x8x16xbf16>
    %4 = vector.shape_cast %3 : vector<1x1x8x16xbf16> to vector<8x16xbf16>
    %c0_4 = arith.constant 0 : index
    %c0_5 = arith.constant 0 : index
    %c0_6 = arith.constant 0 : index
    %c0_7 = arith.constant 0 : index
    %5 = vector.load %arg5[%c0_4, %c0_5, %c0_6, %c0_7] : memref<1x1x8x16xbf16, #tpu.memory_space<vmem>>, vector<1x1x8x16xbf16>
    %6 = vector.shape_cast %5 : vector<1x1x8x16xbf16> to vector<8x16xbf16>
    %c0_8 = arith.constant 0 : index
    %c0_9 = arith.constant 0 : index
    %c0_10 = arith.constant 0 : index
    %c0_11 = arith.constant 0 : index
    %7 = vector.load %arg6[%c0_8, %c0_9, %c0_10, %c0_11] : memref<1x1x8x16xbf16, #tpu.memory_space<vmem>>, vector<1x1x8x16xbf16>
    %8 = vector.shape_cast %7 : vector<1x1x8x16xbf16> to vector<8x16xbf16>
    %cst = arith.constant dense<0.000000e+00> : vector<8x8xf32>
    %9 = tpu.matmul %4, %6, %cst {dimension_numbers = #tpu.dot_dimension_numbers<[1], [1], [0], [0], [0, 0, 1, 0], [], []>} : vector<8x16xbf16>, vector<8x16xbf16>, vector<8x8xf32> -> vector<8x8xf32>
    %cst_12 = arith.constant 2.500000e-01 : f32
    %10 = vector.broadcast %cst_12 : f32 to vector<8x8xf32>
    %11 = arith.mulf %9, %10 : vector<8x8xf32>
    %c0_13 = arith.constant 0 : index
    %c0_14 = arith.constant 0 : index
    %c0_15 = arith.constant 0 : index
    %12 = vector.load %arg7[%c0_13, %c0_14, %c0_15] : memref<1x1x8xf32, #tpu.memory_space<vmem>>, vector<1x1x8xf32>
    %13 = vector.shape_cast %12 : vector<1x1x8xf32> to vector<1x8xf32>
    %14 = vector.broadcast %13 : vector<1x8xf32> to vector<8x8xf32>
    %15 = arith.addf %11, %14 : vector<8x8xf32>
    %c0_16 = arith.constant 0 : index
    %c0_17 = arith.constant 0 : index
    %16 = vector.load %arg9[%c0_16, %c0_17] : memref<8x1xf32, #tpu.memory_space<vmem>>, vector<8x1xf32>
    %cst_18 = arith.constant dense<0xFF800000> : vector<8xf32>
    %17 = vector.multi_reduction <maximumf>, %15, %cst_18 [1] : vector<8x8xf32> to vector<8xf32>
    %18 = vector.shape_cast %17 : vector<8xf32> to vector<8x1xf32>
    %19 = arith.maximumf %16, %18 : vector<8x1xf32>
    %20 = arith.subf %16, %19 : vector<8x1xf32>
    %21 = math.exp %20 : vector<8x1xf32>
    %22 = vector.broadcast %19 : vector<8x1xf32> to vector<8x8xf32>
    %23 = arith.subf %15, %22 : vector<8x8xf32>
    %24 = math.exp %23 : vector<8x8xf32>
    %c0_19 = arith.constant 0 : index
    %c0_20 = arith.constant 0 : index
    %25 = vector.load %arg10[%c0_19, %c0_20] : memref<8x1xf32, #tpu.memory_space<vmem>>, vector<8x1xf32>
    %26 = arith.mulf %21, %25 : vector<8x1xf32>
    %cst_21 = arith.constant dense<0.000000e+00> : vector<8xf32>
    %27 = vector.multi_reduction <add>, %24, %cst_21 [1] : vector<8x8xf32> to vector<8xf32>
    %28 = vector.shape_cast %27 : vector<8xf32> to vector<8x1xf32>
    %29 = arith.addf %26, %28 : vector<8x1xf32>
    %c0_22 = arith.constant 0 : index
    %c0_23 = arith.constant 0 : index
    %30 = vector.load %arg10[%c0_22, %c0_23] : memref<8x1xf32, #tpu.memory_space<vmem>>, vector<8x1xf32>
    tpu.vector_store %arg10[%c0_22, %c0_23], %29 {strides = array<i32>} : memref<8x1xf32, #tpu.memory_space<vmem>>, vector<8x1xf32>,
    %c0_24 = arith.constant 0 : index
    %c0_25 = arith.constant 0 : index
    %31 = vector.load %arg11[%c0_24, %c0_25] : memref<8x16xf32, #tpu.memory_space<vmem>>, vector<8x16xf32>
    %32 = vector.broadcast %21 : vector<8x1xf32> to vector<8x16xf32>
    %33 = arith.mulf %32, %31 : vector<8x16xf32>
    %34 = arith.truncf %24 : vector<8x8xf32> to vector<8x8xbf16>
    %cst_26 = arith.constant dense<0.000000e+00> : vector<8x16xf32>
    %35 = tpu.matmul %34, %8, %cst_26 {dimension_numbers = #tpu.dot_dimension_numbers<[1], [0], [0], [1], [0, 0, 1, 1], [], []>} : vector<8x8xbf16>, vector<8x16xbf16>, vector<8x16xf32> -> vector<8x16xf32>
    %36 = arith.addf %33, %35 : vector<8x16xf32>
    %c0_27 = arith.constant 0 : index
    %c0_28 = arith.constant 0 : index
    %37 = vector.load %arg11[%c0_27, %c0_28] : memref<8x16xf32, #tpu.memory_space<vmem>>, vector<8x16xf32>
    tpu.vector_store %arg11[%c0_27, %c0_28], %36 {strides = array<i32>} : memref<8x16xf32, #tpu.memory_space<vmem>>, vector<8x16xf32>,
    %c0_29 = arith.constant 0 : index
    %c0_30 = arith.constant 0 : index
    %38 = vector.load %arg9[%c0_29, %c0_30] : memref<8x1xf32, #tpu.memory_space<vmem>>, vector<8x1xf32>
    tpu.vector_store %arg9[%c0_29, %c0_30], %19 {strides = array<i32>} : memref<8x1xf32, #tpu.memory_space<vmem>>, vector<8x1xf32>,
    %c0_i32_31 = arith.constant 0 : i32
    %39 = arith.cmpi eq, %arg3, %c0_i32_31 : i32
    %40 = arith.extui %39 : i1 to i32
    %c0_i32_32 = arith.constant 0 : i32
    %41 = arith.cmpi ne, %40, %c0_i32_32 : i32
    scf.if %41 {
      %c0_33 = arith.constant 0 : index
      %c0_34 = arith.constant 0 : index
      %42 = vector.load %arg10[%c0_33, %c0_34] : memref<8x1xf32, #tpu.memory_space<vmem>>, vector<8x1xf32>
      %43 = tpu.reciprocal %42 {approx = true} : vector<8x1xf32> -> vector<8x1xf32>
      %c0_35 = arith.constant 0 : index
      %c0_36 = arith.constant 0 : index
      %44 = vector.load %arg11[%c0_35, %c0_36] : memref<8x16xf32, #tpu.memory_space<vmem>>, vector<8x16xf32>
      %45 = vector.broadcast %43 : vector<8x1xf32> to vector<8x16xf32>
      %46 = arith.mulf %44, %45 : vector<8x16xf32>
      %47 = arith.truncf %46 : vector<8x16xf32> to vector<8x16xbf16>
      %c0_37 = arith.constant 0 : index
      %c0_38 = arith.constant 0 : index
      %c0_39 = arith.constant 0 : index
      %c0_40 = arith.constant 0 : index
      %48 = vector.load %arg8[%c0_37, %c0_38, %c0_39, %c0_40] : memref<1x1x8x16xbf16, #tpu.memory_space<vmem>>, vector<1x1x8x16xbf16>
      %49 = vector.shape_cast %48 : vector<1x1x8x16xbf16> to vector<8x16xbf16>
      %50 = vector.shape_cast %47 : vector<8x16xbf16> to vector<1x1x8x16xbf16>
      tpu.vector_store %arg8[%c0_37, %c0_38, %c0_39, %c0_40], %50 {strides = array<i32>} : memref<1x1x8x16xbf16, #tpu.memory_space<vmem>>, vector<1x1x8x16xbf16>,
    } else {
    }
    return
  }
  func.func @transform_0(%arg0: i32, %arg1: i32, %arg2: i32, %arg3: i32) -> (i32, i32, i32, i32) {
    %c0_i32 = arith.constant 0 : i32
    %c0_i32_0 = arith.constant 0 : i32
    return %arg0, %arg1, %arg2, %c0_i32 : i32, i32, i32, i32
  }
  func.func @transform_1(%arg0: i32, %arg1: i32, %arg2: i32, %arg3: i32) -> (i32, i32, i32, i32) {
    %c0_i32 = arith.constant 0 : i32
    %c0_i32_0 = arith.constant 0 : i32
    return %arg0, %arg1, %arg3, %c0_i32 : i32, i32, i32, i32
  }
  func.func @transform_2(%arg0: i32, %arg1: i32, %arg2: i32, %arg3: i32) -> (i32, i32, i32, i32) {
    %c0_i32 = arith.constant 0 : i32
    %c0_i32_0 = arith.constant 0 : i32
    return %arg0, %arg1, %arg3, %c0_i32 : i32, i32, i32, i32
  }
  func.func @transform_3(%arg0: i32, %arg1: i32, %arg2: i32, %arg3: i32) -> (i32, i32, i32) {
    %c0_i32 = arith.constant 0 : i32
    %c0_i32_0 = arith.constant 0 : i32
    return %arg0, %c0_i32, %arg3 : i32, i32, i32
  }
  func.func @transform_4(%arg0: i32, %arg1: i32, %arg2: i32, %arg3: i32) -> (i32, i32, i32, i32) {
    %c0_i32 = arith.constant 0 : i32
    %c0_i32_0 = arith.constant 0 : i32
    return %arg0, %arg1, %arg2, %c0_i32 : i32, i32, i32, i32
  }
}

module attributes {stable_mosaic.version = 11 : i64} {
  func.func @_linear_res_ln_kernel(%arg0: i32, %arg1: memref<16x32xbf16, #tpu.memory_space<vmem>>, %arg2: memref<32x32xbf16, #tpu.memory_space<vmem>>, %arg3: memref<1x32xf32, #tpu.memory_space<vmem>>, %arg4: memref<16x32xbf16, #tpu.memory_space<vmem>>, %arg5: memref<1x32xf32, #tpu.memory_space<vmem>>, %arg6: memref<1x32xf32, #tpu.memory_space<vmem>>, %arg7: memref<16x32xbf16, #tpu.memory_space<vmem>>) attributes {dimension_semantics = [#tpu.dimension_semantics<parallel>], iteration_bounds = array<i64: 1>, scalar_prefetch = 0 : i64, scratch_operands = 0 : i64, tpu.core_type = #tpu.core_type<tc>, window_params = [{transform_indices = @transform_0, window_bounds = array<i64: 16, 32>}, {pipeline_mode = #tpu.pipeline_mode<synchronous>, transform_indices = @transform_1, window_bounds = array<i64: 32, 32>}, {pipeline_mode = #tpu.pipeline_mode<synchronous>, transform_indices = @transform_2, window_bounds = array<i64: 1, 32>}, {transform_indices = @transform_3, window_bounds = array<i64: 16, 32>}, {pipeline_mode = #tpu.pipeline_mode<synchronous>, transform_indices = @transform_4, window_bounds = array<i64: 1, 32>}, {pipeline_mode = #tpu.pipeline_mode<synchronous>, transform_indices = @transform_5, window_bounds = array<i64: 1, 32>}, {transform_indices = @transform_6, window_bounds = array<i64: 16, 32>}]} {
    %c0 = arith.constant 0 : index
    %c0_0 = arith.constant 0 : index
    %0 = vector.load %arg1[%c0, %c0_0] : memref<16x32xbf16, #tpu.memory_space<vmem>>, vector<16x32xbf16>
    %c0_1 = arith.constant 0 : index
    %c0_2 = arith.constant 0 : index
    %1 = vector.load %arg2[%c0_1, %c0_2] : memref<32x32xbf16, #tpu.memory_space<vmem>>, vector<32x32xbf16>
    %cst = arith.constant dense<0.000000e+00> : vector<16x32xf32>
    %2 = tpu.matmul %0, %1, %cst {dimension_numbers = #tpu.dot_dimension_numbers<[1], [0], [0], [1], [0, 0, 1, 1], [], []>} : vector<16x32xbf16>, vector<32x32xbf16>, vector<16x32xf32> -> vector<16x32xf32>
    %c0_3 = arith.constant 0 : index
    %c0_4 = arith.constant 0 : index
    %3 = vector.load %arg3[%c0_3, %c0_4] : memref<1x32xf32, #tpu.memory_space<vmem>>, vector<1x32xf32>
    %4 = vector.broadcast %3 : vector<1x32xf32> to vector<16x32xf32>
    %5 = arith.addf %2, %4 : vector<16x32xf32>
    %c0_5 = arith.constant 0 : index
    %c0_6 = arith.constant 0 : index
    %6 = vector.load %arg4[%c0_5, %c0_6] : memref<16x32xbf16, #tpu.memory_space<vmem>>, vector<16x32xbf16>
    %7 = arith.extf %6 : vector<16x32xbf16> to vector<16x32xf32>
    %8 = arith.addf %5, %7 : vector<16x32xf32>
    %cst_7 = arith.constant dense<0.000000e+00> : vector<16xf32>
    %9 = vector.multi_reduction <add>, %8, %cst_7 [1] : vector<16x32xf32> to vector<16xf32>
    %10 = vector.shape_cast %9 : vector<16xf32> to vector<16x1xf32>
    %cst_8 = arith.constant 3.200000e+01 : f32
    %11 = vector.broadcast %cst_8 : f32 to vector<16x1xf32>
    %12 = arith.divf %10, %11 : vector<16x1xf32>
    %13 = vector.broadcast %12 : vector<16x1xf32> to vector<16x32xf32>
    %14 = arith.subf %8, %13 : vector<16x32xf32>
    %15 = arith.mulf %14, %14 : vector<16x32xf32>
    %cst_9 = arith.constant dense<0.000000e+00> : vector<16xf32>
    %16 = vector.multi_reduction <add>, %15, %cst_9 [1] : vector<16x32xf32> to vector<16xf32>
    %17 = vector.shape_cast %16 : vector<16xf32> to vector<16x1xf32>
    %cst_10 = arith.constant 3.200000e+01 : f32
    %18 = vector.broadcast %cst_10 : f32 to vector<16x1xf32>
    %19 = arith.divf %17, %18 : vector<16x1xf32>
    %20 = vector.broadcast %12 : vector<16x1xf32> to vector<16x32xf32>
    %21 = arith.subf %8, %20 : vector<16x32xf32>
    %cst_11 = arith.constant 9.99999996E-13 : f32
    %22 = vector.broadcast %cst_11 : f32 to vector<16x1xf32>
    %23 = arith.addf %19, %22 : vector<16x1xf32>
    %24 = math.rsqrt %23 : vector<16x1xf32>
    %25 = vector.broadcast %24 : vector<16x1xf32> to vector<16x32xf32>
    %26 = arith.mulf %21, %25 : vector<16x32xf32>
    %c0_12 = arith.constant 0 : index
    %c0_13 = arith.constant 0 : index
    %27 = vector.load %arg5[%c0_12, %c0_13] : memref<1x32xf32, #tpu.memory_space<vmem>>, vector<1x32xf32>
    %28 = vector.broadcast %27 : vector<1x32xf32> to vector<16x32xf32>
    %29 = arith.mulf %26, %28 : vector<16x32xf32>
    %c0_14 = arith.constant 0 : index
    %c0_15 = arith.constant 0 : index
    %30 = vector.load %arg6[%c0_14, %c0_15] : memref<1x32xf32, #tpu.memory_space<vmem>>, vector<1x32xf32>
    %31 = vector.broadcast %30 : vector<1x32xf32> to vector<16x32xf32>
    %32 = arith.addf %29, %31 : vector<16x32xf32>
    %33 = arith.truncf %32 : vector<16x32xf32> to vector<16x32xbf16>
    %c0_16 = arith.constant 0 : index
    %c0_17 = arith.constant 0 : index
    %34 = vector.load %arg7[%c0_16, %c0_17] : memref<16x32xbf16, #tpu.memory_space<vmem>>, vector<16x32xbf16>
    tpu.vector_store %arg7[%c0_16, %c0_17], %33 {strides = array<i32>} : memref<16x32xbf16, #tpu.memory_space<vmem>>, vector<16x32xbf16>,
    return
  }
  func.func @transform_0(%arg0: i32) -> (i32, i32) {
    %c0_i32 = arith.constant 0 : i32
    %c0_i32_0 = arith.constant 0 : i32
    return %arg0, %c0_i32 : i32, i32
  }
  func.func @transform_1(%arg0: i32) -> (i32, i32) {
    %c0_i32 = arith.constant 0 : i32
    %c0_i32_0 = arith.constant 0 : i32
    %c0_i32_1 = arith.constant 0 : i32
    return %c0_i32, %c0_i32_0 : i32, i32
  }
  func.func @transform_2(%arg0: i32) -> (i32, i32) {
    %c0_i32 = arith.constant 0 : i32
    %c0_i32_0 = arith.constant 0 : i32
    %c0_i32_1 = arith.constant 0 : i32
    return %c0_i32, %c0_i32_0 : i32, i32
  }
  func.func @transform_3(%arg0: i32) -> (i32, i32) {
    %c0_i32 = arith.constant 0 : i32
    %c0_i32_0 = arith.constant 0 : i32
    return %arg0, %c0_i32 : i32, i32
  }
  func.func @transform_4(%arg0: i32) -> (i32, i32) {
    %c0_i32 = arith.constant 0 : i32
    %c0_i32_0 = arith.constant 0 : i32
    %c0_i32_1 = arith.constant 0 : i32
    return %c0_i32, %c0_i32_0 : i32, i32
  }
  func.func @transform_5(%arg0: i32) -> (i32, i32) {
    %c0_i32 = arith.constant 0 : i32
    %c0_i32_0 = arith.constant 0 : i32
    %c0_i32_1 = arith.constant 0 : i32
    return %c0_i32, %c0_i32_0 : i32, i32
  }
  func.func @transform_6(%arg0: i32) -> (i32, i32) {
    %c0_i32 = arith.constant 0 : i32
    %c0_i32_0 = arith.constant 0 : i32
    return %arg0, %c0_i32 : i32, i32
  }
}

module attributes {stable_mosaic.version = 11 : i64} {
  func.func @_linear_kernel(%arg0: i32, %arg1: i32, %arg2: memref<16x32xbf16, #tpu.memory_space<vmem>>, %arg3: memref<32x128xbf16, #tpu.memory_space<vmem>>, %arg4: memref<1x128xf32, #tpu.memory_space<vmem>>, %arg5: memref<16x128xbf16, #tpu.memory_space<vmem>>) attributes {dimension_semantics = [#tpu.dimension_semantics<parallel>, #tpu.dimension_semantics<parallel>], iteration_bounds = array<i64: 1, 1>, scalar_prefetch = 0 : i64, scratch_operands = 0 : i64, tpu.core_type = #tpu.core_type<tc>, window_params = [{transform_indices = @transform_0, window_bounds = array<i64: 16, 32>}, {transform_indices = @transform_1, window_bounds = array<i64: 32, 128>}, {transform_indices = @transform_2, window_bounds = array<i64: 1, 128>}, {transform_indices = @transform_3, window_bounds = array<i64: 16, 128>}]} {
    %c0 = arith.constant 0 : index
    %c0_0 = arith.constant 0 : index
    %0 = vector.load %arg2[%c0, %c0_0] : memref<16x32xbf16, #tpu.memory_space<vmem>>, vector<16x32xbf16>
    %c0_1 = arith.constant 0 : index
    %c0_2 = arith.constant 0 : index
    %1 = vector.load %arg3[%c0_1, %c0_2] : memref<32x128xbf16, #tpu.memory_space<vmem>>, vector<32x128xbf16>
    %cst = arith.constant dense<0.000000e+00> : vector<16x128xf32>
    %2 = tpu.matmul %0, %1, %cst {dimension_numbers = #tpu.dot_dimension_numbers<[1], [0], [0], [1], [0, 0, 1, 1], [], []>} : vector<16x32xbf16>, vector<32x128xbf16>, vector<16x128xf32> -> vector<16x128xf32>
    %c0_3 = arith.constant 0 : index
    %c0_4 = arith.constant 0 : index
    %3 = vector.load %arg4[%c0_3, %c0_4] : memref<1x128xf32, #tpu.memory_space<vmem>>, vector<1x128xf32>
    %4 = vector.broadcast %3 : vector<1x128xf32> to vector<16x128xf32>
    %5 = arith.addf %2, %4 : vector<16x128xf32>
    %cst_5 = arith.constant 5.000000e-01 : f32
    %6 = vector.broadcast %cst_5 : f32 to vector<16x128xf32>
    %7 = arith.mulf %6, %5 : vector<16x128xf32>
    %cst_6 = arith.constant 4.471500e-02 : f32
    %8 = vector.broadcast %cst_6 : f32 to vector<16x128xf32>
    %9 = arith.mulf %8, %5 : vector<16x128xf32>
    %10 = arith.mulf %9, %5 : vector<16x128xf32>
    %11 = arith.mulf %10, %5 : vector<16x128xf32>
    %12 = arith.addf %5, %11 : vector<16x128xf32>
    %cst_7 = arith.constant 0.797884583 : f32
    %13 = vector.broadcast %cst_7 : f32 to vector<16x128xf32>
    %14 = arith.mulf %13, %12 : vector<16x128xf32>
    %15 = math.tanh %14 : vector<16x128xf32>
    %cst_8 = arith.constant 1.000000e+00 : f32
    %16 = vector.broadcast %cst_8 : f32 to vector<16x128xf32>
    %17 = arith.addf %16, %15 : vector<16x128xf32>
    %18 = arith.mulf %7, %17 : vector<16x128xf32>
    %19 = arith.truncf %18 : vector<16x128xf32> to vector<16x128xbf16>
    %c0_9 = arith.constant 0 : index
    %c0_10 = arith.constant 0 : index
    %20 = vector.load %arg5[%c0_9, %c0_10] : memref<16x128xbf16, #tpu.memory_space<vmem>>, vector<16x128xbf16>
    tpu.vector_store %arg5[%c0_9, %c0_10], %19 {strides = array<i32>} : memref<16x128xbf16, #tpu.memory_space<vmem>>, vector<16x128xbf16>,
    return
  }
  func.func @transform_0(%arg0: i32, %arg1: i32) -> (i32, i32) {
    %c0_i32 = arith.constant 0 : i32
    %c0_i32_0 = arith.constant 0 : i32
    return %arg0, %c0_i32 : i32, i32
  }
  func.func @transform_1(%arg0: i32, %arg1: i32) -> (i32, i32) {
    %c0_i32 = arith.constant 0 : i32
    %c0_i32_0 = arith.constant 0 : i32
    return %c0_i32, %arg1 : i32, i32
  }
  func.func @transform_2(%arg0: i32, %arg1: i32) -> (i32, i32) {
    %c0_i32 = arith.constant 0 : i32
    %c0_i32_0 = arith.constant 0 : i32
    return %c0_i32, %arg1 : i32, i32
  }
  func.func @transform_3(%arg0: i32, %arg1: i32) -> (i32, i32) {
    %c0_i32 = arith.constant 0 : i32
    return %arg0, %arg1 : i32, i32
  }
}

module attributes {stable_mosaic.version = 11 : i64} {
  func.func @_linear_res_ln_kernel(%arg0: i32, %arg1: memref<16x128xbf16, #tpu.memory_space<vmem>>, %arg2: memref<128x32xbf16, #tpu.memory_space<vmem>>, %arg3: memref<1x32xf32, #tpu.memory_space<vmem>>, %arg4: memref<16x32xbf16, #tpu.memory_space<vmem>>, %arg5: memref<1x32xf32, #tpu.memory_space<vmem>>, %arg6: memref<1x32xf32, #tpu.memory_space<vmem>>, %arg7: memref<16x32xbf16, #tpu.memory_space<vmem>>) attributes {dimension_semantics = [#tpu.dimension_semantics<parallel>], iteration_bounds = array<i64: 1>, scalar_prefetch = 0 : i64, scratch_operands = 0 : i64, tpu.core_type = #tpu.core_type<tc>, window_params = [{transform_indices = @transform_0, window_bounds = array<i64: 16, 128>}, {pipeline_mode = #tpu.pipeline_mode<synchronous>, transform_indices = @transform_1, window_bounds = array<i64: 128, 32>}, {pipeline_mode = #tpu.pipeline_mode<synchronous>, transform_indices = @transform_2, window_bounds = array<i64: 1, 32>}, {transform_indices = @transform_3, window_bounds = array<i64: 16, 32>}, {pipeline_mode = #tpu.pipeline_mode<synchronous>, transform_indices = @transform_4, window_bounds = array<i64: 1, 32>}, {pipeline_mode = #tpu.pipeline_mode<synchronous>, transform_indices = @transform_5, window_bounds = array<i64: 1, 32>}, {transform_indices = @transform_6, window_bounds = array<i64: 16, 32>}]} {
    %c0 = arith.constant 0 : index
    %c0_0 = arith.constant 0 : index
    %0 = vector.load %arg1[%c0, %c0_0] : memref<16x128xbf16, #tpu.memory_space<vmem>>, vector<16x128xbf16>
    %c0_1 = arith.constant 0 : index
    %c0_2 = arith.constant 0 : index
    %1 = vector.load %arg2[%c0_1, %c0_2] : memref<128x32xbf16, #tpu.memory_space<vmem>>, vector<128x32xbf16>
    %cst = arith.constant dense<0.000000e+00> : vector<16x32xf32>
    %2 = tpu.matmul %0, %1, %cst {dimension_numbers = #tpu.dot_dimension_numbers<[1], [0], [0], [1], [0, 0, 1, 1], [], []>} : vector<16x128xbf16>, vector<128x32xbf16>, vector<16x32xf32> -> vector<16x32xf32>
    %c0_3 = arith.constant 0 : index
    %c0_4 = arith.constant 0 : index
    %3 = vector.load %arg3[%c0_3, %c0_4] : memref<1x32xf32, #tpu.memory_space<vmem>>, vector<1x32xf32>
    %4 = vector.broadcast %3 : vector<1x32xf32> to vector<16x32xf32>
    %5 = arith.addf %2, %4 : vector<16x32xf32>
    %c0_5 = arith.constant 0 : index
    %c0_6 = arith.constant 0 : index
    %6 = vector.load %arg4[%c0_5, %c0_6] : memref<16x32xbf16, #tpu.memory_space<vmem>>, vector<16x32xbf16>
    %7 = arith.extf %6 : vector<16x32xbf16> to vector<16x32xf32>
    %8 = arith.addf %5, %7 : vector<16x32xf32>
    %cst_7 = arith.constant dense<0.000000e+00> : vector<16xf32>
    %9 = vector.multi_reduction <add>, %8, %cst_7 [1] : vector<16x32xf32> to vector<16xf32>
    %10 = vector.shape_cast %9 : vector<16xf32> to vector<16x1xf32>
    %cst_8 = arith.constant 3.200000e+01 : f32
    %11 = vector.broadcast %cst_8 : f32 to vector<16x1xf32>
    %12 = arith.divf %10, %11 : vector<16x1xf32>
    %13 = vector.broadcast %12 : vector<16x1xf32> to vector<16x32xf32>
    %14 = arith.subf %8, %13 : vector<16x32xf32>
    %15 = arith.mulf %14, %14 : vector<16x32xf32>
    %cst_9 = arith.constant dense<0.000000e+00> : vector<16xf32>
    %16 = vector.multi_reduction <add>, %15, %cst_9 [1] : vector<16x32xf32> to vector<16xf32>
    %17 = vector.shape_cast %16 : vector<16xf32> to vector<16x1xf32>
    %cst_10 = arith.constant 3.200000e+01 : f32
    %18 = vector.broadcast %cst_10 : f32 to vector<16x1xf32>
    %19 = arith.divf %17, %18 : vector<16x1xf32>
    %20 = vector.broadcast %12 : vector<16x1xf32> to vector<16x32xf32>
    %21 = arith.subf %8, %20 : vector<16x32xf32>
    %cst_11 = arith.constant 9.99999996E-13 : f32
    %22 = vector.broadcast %cst_11 : f32 to vector<16x1xf32>
    %23 = arith.addf %19, %22 : vector<16x1xf32>
    %24 = math.rsqrt %23 : vector<16x1xf32>
    %25 = vector.broadcast %24 : vector<16x1xf32> to vector<16x32xf32>
    %26 = arith.mulf %21, %25 : vector<16x32xf32>
    %c0_12 = arith.constant 0 : index
    %c0_13 = arith.constant 0 : index
    %27 = vector.load %arg5[%c0_12, %c0_13] : memref<1x32xf32, #tpu.memory_space<vmem>>, vector<1x32xf32>
    %28 = vector.broadcast %27 : vector<1x32xf32> to vector<16x32xf32>
    %29 = arith.mulf %26, %28 : vector<16x32xf32>
    %c0_14 = arith.constant 0 : index
    %c0_15 = arith.constant 0 : index
    %30 = vector.load %arg6[%c0_14, %c0_15] : memref<1x32xf32, #tpu.memory_space<vmem>>, vector<1x32xf32>
    %31 = vector.broadcast %30 : vector<1x32xf32> to vector<16x32xf32>
    %32 = arith.addf %29, %31 : vector<16x32xf32>
    %33 = arith.truncf %32 : vector<16x32xf32> to vector<16x32xbf16>
    %c0_16 = arith.constant 0 : index
    %c0_17 = arith.constant 0 : index
    %34 = vector.load %arg7[%c0_16, %c0_17] : memref<16x32xbf16, #tpu.memory_space<vmem>>, vector<16x32xbf16>
    tpu.vector_store %arg7[%c0_16, %c0_17], %33 {strides = array<i32>} : memref<16x32xbf16, #tpu.memory_space<vmem>>, vector<16x32xbf16>,
    return
  }
  func.func @transform_0(%arg0: i32) -> (i32, i32) {
    %c0_i32 = arith.constant 0 : i32
    %c0_i32_0 = arith.constant 0 : i32
    return %arg0, %c0_i32 : i32, i32
  }
  func.func @transform_1(%arg0: i32) -> (i32, i32) {
    %c0_i32 = arith.constant 0 : i32
    %c0_i32_0 = arith.constant 0 : i32
    %c0_i32_1 = arith.constant 0 : i32
    return %c0_i32, %c0_i32_0 : i32, i32
  }
  func.func @transform_2(%arg0: i32) -> (i32, i32) {
    %c0_i32 = arith.constant 0 : i32
    %c0_i32_0 = arith.constant 0 : i32
    %c0_i32_1 = arith.constant 0 : i32
    return %c0_i32, %c0_i32_0 : i32, i32
  }
  func.func @transform_3(%arg0: i32) -> (i32, i32) {
    %c0_i32 = arith.constant 0 : i32
    %c0_i32_0 = arith.constant 0 : i32
    return %arg0, %c0_i32 : i32, i32
  }
  func.func @transform_4(%arg0: i32) -> (i32, i32) {
    %c0_i32 = arith.constant 0 : i32
    %c0_i32_0 = arith.constant 0 : i32
    %c0_i32_1 = arith.constant 0 : i32
    return %c0_i32, %c0_i32_0 : i32, i32
  }
  func.func @transform_5(%arg0: i32) -> (i32, i32) {
    %c0_i32 = arith.constant 0 : i32
    %c0_i32_0 = arith.constant 0 : i32
    %c0_i32_1 = arith.constant 0 : i32
    return %c0_i32, %c0_i32_0 : i32, i32
  }
  func.func @transform_6(%arg0: i32) -> (i32, i32) {
    %c0_i32 = arith.constant 0 : i32
    %c0_i32_0 = arith.constant 0 : i32
    return %arg0, %c0_i32 : i32, i32
  }
}

module attributes {stable_mosaic.version = 11 : i64} {
  func.func @_head_kernel(%arg0: memref<2x32xbf16, #tpu.memory_space<vmem>>, %arg1: memref<32x32xbf16, #tpu.memory_space<vmem>>, %arg2: memref<1x32xf32, #tpu.memory_space<vmem>>, %arg3: memref<32x3xbf16, #tpu.memory_space<vmem>>, %arg4: memref<1x3xf32, #tpu.memory_space<vmem>>, %arg5: memref<2x3xf32, #tpu.memory_space<vmem>>) attributes {dimension_semantics = [], scalar_prefetch = 0 : i64, scratch_operands = 0 : i64, tpu.core_type = #tpu.core_type<tc>} {
    %c0 = arith.constant 0 : index
    %c0_0 = arith.constant 0 : index
    %0 = vector.load %arg0[%c0, %c0_0] : memref<2x32xbf16, #tpu.memory_space<vmem>>, vector<2x32xbf16>
    %c0_1 = arith.constant 0 : index
    %c0_2 = arith.constant 0 : index
    %1 = vector.load %arg1[%c0_1, %c0_2] : memref<32x32xbf16, #tpu.memory_space<vmem>>, vector<32x32xbf16>
    %cst = arith.constant dense<0.000000e+00> : vector<2x32xf32>
    %2 = tpu.matmul %0, %1, %cst {dimension_numbers = #tpu.dot_dimension_numbers<[1], [0], [0], [1], [0, 0, 1, 1], [], []>} : vector<2x32xbf16>, vector<32x32xbf16>, vector<2x32xf32> -> vector<2x32xf32>
    %c0_3 = arith.constant 0 : index
    %c0_4 = arith.constant 0 : index
    %3 = vector.load %arg2[%c0_3, %c0_4] : memref<1x32xf32, #tpu.memory_space<vmem>>, vector<1x32xf32>
    %4 = vector.broadcast %3 : vector<1x32xf32> to vector<2x32xf32>
    %5 = arith.addf %2, %4 : vector<2x32xf32>
    %6 = math.tanh %5 : vector<2x32xf32>
    %7 = arith.truncf %6 : vector<2x32xf32> to vector<2x32xbf16>
    %c0_5 = arith.constant 0 : index
    %c0_6 = arith.constant 0 : index
    %8 = vector.load %arg3[%c0_5, %c0_6] : memref<32x3xbf16, #tpu.memory_space<vmem>>, vector<32x3xbf16>
    %cst_7 = arith.constant dense<0.000000e+00> : vector<2x3xf32>
    %9 = tpu.matmul %7, %8, %cst_7 {dimension_numbers = #tpu.dot_dimension_numbers<[1], [0], [0], [1], [0, 0, 1, 1], [], []>} : vector<2x32xbf16>, vector<32x3xbf16>, vector<2x3xf32> -> vector<2x3xf32>
    %c0_8 = arith.constant 0 : index
    %c0_9 = arith.constant 0 : index
    %10 = vector.load %arg4[%c0_8, %c0_9] : memref<1x3xf32, #tpu.memory_space<vmem>>, vector<1x3xf32>
    %11 = vector.broadcast %10 : vector<1x3xf32> to vector<2x3xf32>
    %12 = arith.addf %9, %11 : vector<2x3xf32>
    %c0_10 = arith.constant 0 : index
    %c0_11 = arith.constant 0 : index
    %13 = vector.load %arg5[%c0_10, %c0_11] : memref<2x3xf32, #tpu.memory_space<vmem>>, vector<2x3xf32>
    tpu.vector_store %arg5[%c0_10, %c0_11], %12 {strides = array<i32>} : memref<2x3xf32, #tpu.memory_space<vmem>>, vector<2x3xf32>,
    return
  }
}

</mosaic_0001>

<bundles_post_ra>
// kernel: bert_classifier_forward.13
= control target key start
LH: loop header
LB: loop body
LE: loop exit
PB: predicated region body
PF: predicated region fallthrough
CT: control target
= control target key end

     0   :  { %v130_v0 = vmov 0.0   ;;  %vm131_vm0 = vmmov 0   ;;  %vm45_vm1 = vcmask 261120   ;;  %vm98_vm2 = vcmask 781312   ;;  %s170_s1 = inlined_call_operand.vmem [shape: bf16[32,96], index: 1, kind: input, shape index: {}]   ;;  %s171_s0 = inlined_call_operand.vmem [shape: bf16[16,32], index: 0, kind: input, shape index: {}]   ;;  %s172_s2 = inlined_call_operand.vmem [shape: f32[1,96], index: 2, kind: input, shape index: {}]   ;;  %s173_s3 = inlined_call_operand.vmem [shape: bf16[16,96], index: 3, kind: output, shape index: {}]  }
   0x1   :  { %117 = vmatprep.subr.bf16.mxu0 %v130_v0  ;;  %v127_v1 = vld [vmem:[%s170_s1] sm:$0xff]   ;;  %121 = vmatprep.mubr.msk.bf16.mxu0 %vm131_vm0, %v130_v0  ;;  %v128_v2 = vld [vmem:[%s170_s1 + $0x8] sm:$0xff]  }
   0x2   :  { %118 = vmatpush3.bf16.msra.mxu0 %v127_v1  ;;  %v129_v3 = vld [vmem:[%s171_s0] sm:$0xff]  }
   0x3   :  { %119 = vmatprep.subr.bf16.mxu0 %v130_v0  ;;  %v105_v4 = vld [vmem:[%s172_s2] ss:$0 sm:$0xff] }
   0x6   :  { %120 = vmatpush3.bf16.msra.mxu0 %v128_v2 }
   0x9   :  { %122 = vmatmul.mubr.msk.bf16.vlgmr.msra.gmra.mrb[0].mxu0 %vm45_vm1, %v129_v3 }
  0xdc   :  { %v83_v5 = vpop.f32.mrb[0].mxu0 }
  0xdd   :  { %v84_v6 = vadd.f32 %v105_v4, %v83_v5  ;;  %v123_v7 = vpop.f32.mrb[1].mxu0 }
  0xde   :  { %v86_v8 = vpop.f32.mrb[2].mxu0 }
  0xdf   :  { %v112_v9 = vpack.c.bf16 %v84_v6, %v84_v6  ;;  %v87_v10 = vadd.f32 %v105_v4, %v86_v8  ;;  %v124_v11 = vpop.f32.mrb[3].mxu0 }
  0xe1   :  { %99 = vst.msk [vmem:[%s173_s3] sm:$0xf] %vm98_vm2, %v112_v9  ;;  %v113_v12 = vpack.c.bf16 %v87_v10, %v87_v10 }
  0xe3   :  { %100 = vst.msk [vmem:[%s173_s3 + $0x4] sm:$0xf] %vm98_vm2, %v113_v12 }

// kernel: bert_classifier_forward.12
= control target key start
LH: loop header
LB: loop body
LE: loop exit
PB: predicated region body
PF: predicated region fallthrough
CT: control target
= control target key end

     0   :  { %vm16_vm0 = vcmask 261120   ;;  %vm70_vm1 = vcmask 257024   ;;  %s129_s0 = inlined_call_operand.vmem [shape: f32[16,32], index: 0, kind: input, shape index: {}]   ;;  %s130_s1 = inlined_call_operand.vmem [shape: f32[1,32], index: 1, kind: input, shape index: {}]   ;;  %s131_s2 = inlined_call_operand.vmem [shape: f32[1,32], index: 2, kind: input, shape index: {}]   ;;  %s132_s3 = inlined_call_operand.vmem [shape: bf16[16,32], index: 3, kind: output, shape index: {}]  }
   0x1   :  { %v14_v0 = vld [vmem:[%s129_s0] sm:$0xff]  ;;  %v15_v1 = vld [vmem:[%s129_s0 + $0x8] sm:$0xff] }
   0x2   :  { %v17_v2 = vsel %vm16_vm0, %v14_v0, 0.0  ;;  %v20_v3 = vsel %vm16_vm0, %v15_v1, 0.0  ;;  %v77_v21 = vld [vmem:[%s130_s1] ss:$0 sm:$0xff] }
   0x3   :  { %18 = vadd.xlane.f32.xlu0 %v17_v2  ;;  %v78_v23 = vld [vmem:[%s131_s2] ss:$0 sm:$0xff] }
   0x7   :  { %21 = vadd.xlane.f32.xlu0 %v20_v3 }
  0x90   :  { %v19_v4 = vpop.xlane.xlu0 %18 }
  0x91   :  { %v24_v5 = vmul.f32 0.03125, %v19_v4 }
  0x93   :  { %v26_v6 = vsub.f32 %v14_v0, %v24_v5 }
  0x94   :  { %v22_v7 = vpop.xlane.xlu0 %21 }
  0x95   :  { %v25_v8 = vmul.f32 0.03125, %v22_v7  ;;  %v28_v9 = vmul.f32 %v26_v6, %v26_v6 }
  0x97   :  { %v27_v10 = vsub.f32 %v15_v1, %v25_v8  ;;  %v30_v11 = vsel %vm16_vm0, %v28_v9, 0.0 }
  0x98   :  { %31 = vadd.xlane.f32.xlu1 %v30_v11 }
  0x99   :  { %v29_v12 = vmul.f32 %v27_v10, %v27_v10 }
  0x9b   :  { %v33_v13 = vsel %vm16_vm0, %v29_v12, 0.0 }
  0x9c   :  { %34 = vadd.xlane.f32.xlu1 %v33_v13 }
 0x125   :  { %v32_v14 = vpop.xlane.xlu1 %31 }
 0x126   :  { %v36_v15 = vmul.f32 0.03125, %v32_v14 }
 0x128   :  { %v38_v16 = vadd.f32 1e-12, %v36_v15 }
 0x129   :  { %v35_v17 = vpop.xlane.xlu1 %34 }
 0x12a   :  { %83 = vrsqrt.f32 %v38_v16  ;;  %v37_v18 = vmul.f32 0.03125, %v35_v17 }
 0x12c   :  { %v39_v19 = vadd.f32 1e-12, %v37_v18 }
 0x12e   :  { %85 = vrsqrt.f32 %v39_v19 }
 0x134   :  { %v84_v20 = vpop.eup %83 }
 0x135   :  { %v42_v22 = vmul.f32 %v84_v20, %v26_v6 }
 0x137   :  { %v51_v24 = vmul.f32 %v77_v21, %v42_v22 }
 0x138   :  { %v86_v25 = vpop.eup %85 }
 0x139   :  { %v60_v26 = vadd.f32 %v78_v23, %v51_v24  ;;  %v43_v27 = vmul.f32 %v86_v25, %v27_v10 }
 0x13b   :  { %v81_v28 = vpack.c.bf16 %v60_v26, %v60_v26  ;;  %v52_v29 = vmul.f32 %v77_v21, %v43_v27 }
 0x13d   :  { %71 = vst.msk [vmem:[%s132_s3] sm:$0xf] %vm70_vm1, %v81_v28  ;;  %v61_v30 = vadd.f32 %v78_v23, %v52_v29 }
 0x13f   :  { %v82_v31 = vpack.c.bf16 %v61_v30, %v61_v30 }
 0x141   :  { %72 = vst.msk [vmem:[%s132_s3 + $0x4] sm:$0xf] %vm70_vm1, %v82_v31 }

// kernel: bert_classifier_forward.14
= control target key start
LH: loop header
LB: loop body
LE: loop exit
PB: predicated region body
PF: predicated region fallthrough
CT: control target
= control target key end

     0   :  { %s852_s15 = smov 0   ;;  %s854_s16 = smov 0   ;;  %s929_s0 = inlined_call_operand.vmem [shape: bf16[2,2,8,16], index: 0, kind: input, shape index: {}]   ;;  %s930_s1 = inlined_call_operand.vmem [shape: bf16[2,2,8,16], index: 1, kind: input, shape index: {}]   ;;  %s931_s2 = inlined_call_operand.vmem [shape: bf16[2,2,8,16], index: 2, kind: input, shape index: {}]   ;;  %s932_s3 = inlined_call_operand.vmem [shape: f32[2,1,8], index: 3, kind: input, shape index: {}]   ;;  %s933_s4 = inlined_call_operand.vmem [shape: bf16[2,2,8,16], index: 4, kind: output, shape index: {}]  }
   0x1   :  { %s856_s17 = smov 0   ;;  %s858_s18 = smov 0  }
   0x2   :  { %s860_s19 = smov 0  }
   0x3 LB: > { %s36_s20 = sadd.s32 1, %s813_s17  ;;  %s40_s21 = sadd.s32 1, %s817_s18  ;;  %s821_s19 = sphi %s860_s19, %s14_s19   ;;  %s817_s18 = sphi %s858_s18, %s937_s18   ;;  %s813_s17 = sphi %s856_s17, %s936_s17   ;;  %s809_s16 = sphi %s854_s16, %s935_s16   ;;  %s805_s15 = sphi %s852_s15, %s934_s15  }
   0x4   : > { %p38_p0 = scmp.ge.s32.totalorder %s36_s20, 2  ;;  %p701_p1 = scmp.ge.s32.totalorder %s821_s19, 1 }
   0x5   : > { %p255_p2 = scmp.lt.s32.totalorder %s821_s19, 5 }
   0x6   : > { %s939_s20 = smov (%p38_p0, %s36_s20), 0  ;;  %s941_s21 = smov (!%p38_p0, %s40_s21), %s817_s18 }
   0x7   : > { %p256_p3 = pnand %p701_p1, %p255_p2  ;;  %p42_p4 = scmp.ge.s32.totalorder %s941_s21, 2 }
   0x8   : > { %p321_p5 = scmp.lt.s32.totalorder (!%p256_p3), %s809_s16, 1  ;;  %p323_p6 = scmp.lt.s32.totalorder (!%p256_p3), %s805_s15, 1  ;;  %vm379_vm0 = vcmask (!%p256_p3), 130048   ;;  %v823_v0 = vmov (!%p256_p3), 0.0   ;;  %vm824_vm1 = vmmov (!%p256_p3), 0   ;;  %vm376_vm2 = vcmask (!%p256_p3), 7168  }
   0x9   : > { %s943_s21 = smov (%p42_p4, %s941_s21), 0  ;;  %259 = sbr.rel (%p256_p3) target bundleno = 831 (0x33f), region = 36 }
   0xa   : > { %719 = vmatprep.subr.bf16.mxu0 (!%p256_p3), %v823_v0  ;;  %380 = vst.msk [vmem:[#allocation4] sm:$0xff] (!%p256_p3), %vm379_vm0, %v823_v0  ;;  %721 = vmatprep.mubr.msk.bf16.mxu0 (!%p256_p3), %vm824_vm1, %v823_v0  ;;  %v825_v4 = vmov (!%p256_p3), -inf   ;;  %vm441_vm3 = vcmask (!%p256_p3), 64512   ;;  %v826_v13 = vmov (!%p256_p3), 0   ;;  %vm476_vm4 = vcmask (!%p256_p3), 1043456  }
   0xb   : > { %725 = vmatprep.subr.bf16.mxu1 (!%p256_p3), %v823_v0  ;;  %727 = vmatprep.mubr.msk.bf16.mxu1 (!%p256_p3), %vm824_vm1, %v823_v0  ;;  %377 = vst.msk [vmem:[#allocation2] sm:$0xff] (!%p256_p3), %vm376_vm2, %v825_v4  ;;  %378 = vst.msk [vmem:[#allocation3] sm:$0xff] (!%p256_p3), %vm376_vm2, %v823_v0  ;;  %vm536_vm5 = vcmask (!%p256_p3), 125952  }
   0xc   : > { %775 = vset.pattern.permute.xlu0 (!%p256_p3), %v826_v13  ;;  %776 = vset.pattern.permute.xlu1 (!%p256_p3), %v826_v13 }
  0x10   : > { %s945_s16 = smov (!%p321_p5, %s809_s16), 1  ;;  %s947_s15 = smov (!%p323_p6, %s805_s15), 1 }
  0x11   : > { %s702_s22 = sshll.u32 %s945_s16, 1  ;;  %s359_s7 = scalar_lea.vmem %s932_s3, %s945_s16  ;;  %v465_v34 = vld [vmem:[#allocation4] sm:$0xff] }
  0x12   : > { %s329_s23 = sadd.s32 %s702_s22, %s947_s15  ;;  %v711_v6 = vld [vmem:[%s359_s7] ss:$0 sm:$0xff]  ;;  %v457_v28 = vld [vmem:[#allocation3] sm:$0xff] }
  0x13   : > { %s883_s24 = sshll.u32 %s329_s23, 2  ;;  %v440_v14 = vld [vmem:[#allocation2] sm:$0xff] }
  0x14   : > { %s342_s27 = scalar_lea.vmem %s930_s1, %s883_s24  ;;  %s331_s30 = scalar_lea.vmem %s929_s0, %s883_s24 }
  0x15   : > { %v382_v1 = vld [vmem:[%s342_s27] sm:$0xf]  ;;  %s353_s10 = scalar_lea.vmem %s931_s2, %s883_s24  ;;  %s370_s13 = scalar_lea.vmem %s933_s4, %s883_s24 }
  0x16   : > { %v389_v2 = vsel %vm379_vm0, %v382_v1, 0  ;;  %v381_v3 = vld [vmem:[%s331_s30] sm:$0xf] }
  0x17   : > { %720 = vmatpush3.bf16.xpose.msra.mxu0 %v389_v2  ;;  %v383_v18 = vld [vmem:[%s353_s10] sm:$0xf] }
  0x18   : > { %v478_v19 = vsel %vm476_vm4, %v383_v18, 0 }
  0x19   : > { %726 = vmatpush3.bf16.msra.mxu1 %v478_v19 }
  0x1e   : > { %722 = vmatmul.mubr.msk.bf16.vlgmr.msra.gmra.mrb[0].mxu0 %vm379_vm0, %v381_v3 }
  0xf1   : > { %v425_v5 = vpop.f32.mrb[0].mxu0 }
  0xf2   : > { %v431_v7 = vmul.f32 0.25, %v425_v5  ;;  %v723_v8 = vpop.f32.mrb[1].mxu0 }
  0xf3   : > { %v428_v9 = vpop.f32.mrb[2].mxu0 }
  0xf4   : > { %v724_v10 = vpop.f32.mrb[3].mxu0  ;;  %v439_v11 = vadd.f32 %v711_v6, %v431_v7 }
  0xf6   : > { %v442_v12 = vsel %vm441_vm3, %v439_v11, -inf }
  0xf7   : > { %443 = vmax.xlane.f32.xlu0 %v442_v12 }
 0x184   : > { %v444_v15 = vpop.xlane.xlu0 %443 }
 0x185   : > { %v445_v16 = vmax.f32 %v440_v14, %v444_v15 }
 0x187   : > { %v446_v17 = vsub.f32 %v440_v14, %v445_v16  ;;  %522 = vst.msk [vmem:[#allocation2] sm:$0xff] %vm376_vm2, %v445_v16  ;;  %451 = vperm.xlu0 %775, %v445_v16  }
 0x189   : > { %v447_v26 = vmul.f32 1.442695, %v446_v17 }
 0x206   : > { %v452_v20 = vpop.permute.xlu0 %451 }
 0x207   : > { %v454_v21 = vsub.f32 %v439_v11, %v452_v20 }
 0x209   : > { %v455_v22 = vmul.f32 1.442695, %v454_v21 }
 0x20b   : > { %777 = vpow2.f32 %v455_v22 }
 0x20c   : > { %779 = vpow2.f32 %v447_v26 }
 0x215   : > { %v778_v23 = vpop.eup %777 }
 0x216   : > { %v459_v24 = vsel %vm441_vm3, %v778_v23, 0.0  ;;  %v472_v25 = vpack.c.bf16 %v778_v23, %v778_v23  ;;  %v780_v27 = vpop.eup %779 }
 0x217   : > { %460 = vadd.xlane.f32.xlu1 %v459_v24  ;;  %v458_v29 = vmul.f32 %v780_v27, %v457_v28 }
 0x218   : > { %728 = vmatmul.mubr.msk.bf16.vlgmr.msra.gmra.mrb[0].mxu1 %vm441_vm3, %v472_v25 }
 0x228   : > { %468 = vperm.xlu1 %776, %v780_v27  }
 0x2a4   : > { %v461_v30 = vpop.xlane.xlu1 %460 }
 0x2a5   : > { %v462_v31 = vadd.f32 %v461_v30, %v458_v29 }
 0x2a7   : > { %464 = vst.msk [vmem:[#allocation3] sm:$0xff] %vm376_vm2, %v462_v31 }
 0x2a8   : > { %v469_v35 = vpop.permute.xlu1 %468 }
 0x2a9   : > { %v471_v36 = vmul.f32 %v469_v35, %v465_v34 }
 0x2ae   : > { %v526_v32 = vld [vmem:[#allocation3] sm:$0xff] }
 0x2af   : > { %781 = vrcp.f32 %v526_v32 }
 0x2b9   : > { %v782_v33 = vpop.eup %781 }
 0x2ba   : > { %531 = vperm.xlu1 %776, %v782_v33  }
 0x2eb   : > { %v514_v37 = vpop.f32.mrb[0].mxu1 }
 0x2ec   : > { %v520_v38 = vadd.f32 %v514_v37, %v471_v36  ;;  %v729_v39 = vpop.f32.mrb[1].mxu1 }
 0x2ed   : > { %v517_v40 = vpop.f32.mrb[2].mxu1 }
 0x2ee   : > { %521 = vst.msk [vmem:[#allocation4] sm:$0xff] %vm379_vm0, %v520_v38  ;;  %v730_v41 = vpop.f32.mrb[3].mxu1 }
 0x2f5   : > { %v528_v42 = vld [vmem:[#allocation4] sm:$0xff] }
 0x339   : > { %v532_v43 = vpop.permute.xlu1 %531 }
 0x33a   : > { %v534_v44 = vmul.f32 %v532_v43, %v528_v42 }
 0x33c   : > { %v535_v45 = vpack.c.bf16 %v534_v44, %v534_v44 }
 0x33e   : > { %537 = vst.msk [vmem:[%s370_s13] sm:$0xf] %vm536_vm5, %v535_v45 }
 0x33f PF: > { %s14_s19 = sadd.s32 1, %s821_s19   ;;  %s934_s15 = smov %s813_s17 }
 0x340   : > { %p11_p7 = scmp.ge.s32.totalorder %s14_s19, 6   ;;  %s935_s16 = smov %s817_s18 }
 0x341   : > { %s936_s17 = smov %s939_s20  ;;  %s937_s18 = smov %s943_s21 }
 0x342   :  { %13 = sbr.rel (!%p11_p7) target bundleno = 3 (0x3), region = 83 }

// kernel: bert_classifier_forward.15
= control target key start
LH: loop header
LB: loop body
LE: loop exit
PB: predicated region body
PF: predicated region fallthrough
CT: control target
= control target key end

     0   :  { %v200_v0 = vmov 0.0   ;;  %vm201_vm0 = vmmov 0   ;;  %vm54_vm1 = vcmask 261120   ;;  %vm158_vm2 = vcmask 257024   ;;  %s269_s1 = inlined_call_operand.vmem [shape: bf16[32,32], index: 1, kind: input, shape index: {}]   ;;  %s270_s0 = inlined_call_operand.vmem [shape: bf16[16,32], index: 0, kind: input, shape index: {}]   ;;  %s271_s3 = inlined_call_operand.vmem [shape: bf16[16,32], index: 3, kind: input, shape index: {}]   ;;  %s272_s2 = inlined_call_operand.vmem [shape: f32[1,32], index: 2, kind: input, shape index: {}]   ;;  %s273_s4 = inlined_call_operand.vmem [shape: f32[1,32], index: 4, kind: input, shape index: {}]   ;;  %s274_s5 = inlined_call_operand.vmem [shape: f32[1,32], index: 5, kind: input, shape index: {}]   ;;  %s275_s6 = inlined_call_operand.vmem [shape: bf16[16,32], index: 6, kind: output, shape index: {}]  }
   0x1   :  { %183 = vmatprep.subr.bf16.mxu0 %v200_v0  ;;  %v193_v1 = vld [vmem:[%s269_s1] sm:$0xff]   ;;  %187 = vmatprep.mubr.msk.bf16.mxu0 %vm201_vm0, %v200_v0  ;;  %v194_v2 = vld [vmem:[%s269_s1 + $0x8] sm:$0xff]  }
   0x2   :  { %184 = vmatpush3.bf16.msra.mxu0 %v193_v1  ;;  %v195_v3 = vld [vmem:[%s270_s0] sm:$0xff]  }
   0x3   :  { %185 = vmatprep.subr.bf16.mxu0 %v200_v0  ;;  %v177_v4 = vld [vmem:[%s271_s3] sm:$0xff]  }
   0x4   :  { %v165_v5 = vld [vmem:[%s272_s2] ss:$0 sm:$0xff]  ;;  %v178_v6 = vunpack.c.l.bf16 %v177_v4  ;;  %v179_v10 = vunpack.c.h.bf16 %v177_v4 }
   0x5   :  { %v170_v35 = vld [vmem:[%s273_s4] ss:$0 sm:$0xff] }
   0x6   :  { %186 = vmatpush3.bf16.msra.mxu0 %v194_v2  ;;  %v171_v37 = vld [vmem:[%s274_s5] ss:$0 sm:$0xff] }
   0x9   :  { %188 = vmatmul.mubr.msk.bf16.vlgmr.msra.gmra.mrb[0].mxu0 %vm54_vm1, %v195_v3 }
  0xdc   :  { %v92_v7 = vpop.f32.mrb[0].mxu0 }
  0xdd   :  { %v93_v8 = vadd.f32 %v165_v5, %v92_v7  ;;  %v189_v9 = vpop.f32.mrb[1].mxu0 }
  0xde   :  { %v95_v11 = vpop.f32.mrb[2].mxu0 }
  0xdf   :  { %v96_v12 = vadd.f32 %v165_v5, %v95_v11  ;;  %v190_v13 = vpop.f32.mrb[3].mxu0  ;;  %v103_v14 = vadd.f32 %v178_v6, %v93_v8 }
  0xe1   :  { %v105_v15 = vsel %vm54_vm1, %v103_v14, 0.0  ;;  %v104_v16 = vadd.f32 %v179_v10, %v96_v12 }
  0xe2   :  { %106 = vadd.xlane.f32.xlu0 %v105_v15 }
  0xe3   :  { %v108_v17 = vsel %vm54_vm1, %v104_v16, 0.0 }
  0xe6   :  { %109 = vadd.xlane.f32.xlu0 %v108_v17 }
 0x16f   :  { %v107_v18 = vpop.xlane.xlu0 %106 }
 0x170   :  { %v112_v19 = vmul.f32 0.03125, %v107_v18 }
 0x172   :  { %v114_v20 = vsub.f32 %v103_v14, %v112_v19 }
 0x173   :  { %v110_v21 = vpop.xlane.xlu0 %109 }
 0x174   :  { %v113_v22 = vmul.f32 0.03125, %v110_v21  ;;  %v116_v23 = vmul.f32 %v114_v20, %v114_v20 }
 0x176   :  { %v115_v24 = vsub.f32 %v104_v16, %v113_v22  ;;  %v118_v25 = vsel %vm54_vm1, %v116_v23, 0.0 }
 0x177   :  { %119 = vadd.xlane.f32.xlu1 %v118_v25 }
 0x178   :  { %v117_v26 = vmul.f32 %v115_v24, %v115_v24 }
 0x17a   :  { %v121_v27 = vsel %vm54_vm1, %v117_v26, 0.0 }
 0x17b   :  { %122 = vadd.xlane.f32.xlu1 %v121_v27 }
 0x204   :  { %v120_v28 = vpop.xlane.xlu1 %119 }
 0x205   :  { %v124_v29 = vmul.f32 0.03125, %v120_v28 }
 0x207   :  { %v126_v30 = vadd.f32 1e-12, %v124_v29 }
 0x208   :  { %v123_v31 = vpop.xlane.xlu1 %122 }
 0x209   :  { %196 = vrsqrt.f32 %v126_v30  ;;  %v125_v32 = vmul.f32 0.03125, %v123_v31 }
 0x20b   :  { %v127_v33 = vadd.f32 1e-12, %v125_v32 }
 0x20d   :  { %198 = vrsqrt.f32 %v127_v33 }
 0x213   :  { %v197_v34 = vpop.eup %196 }
 0x214   :  { %v130_v36 = vmul.f32 %v197_v34, %v114_v20 }
 0x216   :  { %v139_v38 = vmul.f32 %v170_v35, %v130_v36 }
 0x217   :  { %v199_v39 = vpop.eup %198 }
 0x218   :  { %v148_v40 = vadd.f32 %v171_v37, %v139_v38  ;;  %v131_v41 = vmul.f32 %v199_v39, %v115_v24 }
 0x21a   :  { %v174_v42 = vpack.c.bf16 %v148_v40, %v148_v40  ;;  %v140_v43 = vmul.f32 %v170_v35, %v131_v41 }
 0x21c   :  { %159 = vst.msk [vmem:[%s275_s6] sm:$0xf] %vm158_vm2, %v174_v42  ;;  %v149_v44 = vadd.f32 %v171_v37, %v140_v43 }
 0x21e   :  { %v175_v45 = vpack.c.bf16 %v149_v44, %v149_v44 }
 0x220   :  { %160 = vst.msk [vmem:[%s275_s6 + $0x4] sm:$0xf] %vm158_vm2, %v175_v45 }

// kernel: bert_classifier_forward.16
= control target key start
LH: loop header
LB: loop body
LE: loop exit
PB: predicated region body
PF: predicated region fallthrough
CT: control target
= control target key end

     0   :  { %v156_v0 = vmov 0.0   ;;  %vm157_vm0 = vmmov 0   ;;  %vm45_vm1 = vcmask 261120   ;;  %s193_s1 = inlined_call_operand.vmem [shape: bf16[32,128], index: 1, kind: input, shape index: {}]   ;;  %s194_s0 = inlined_call_operand.vmem [shape: bf16[16,32], index: 0, kind: input, shape index: {}]   ;;  %s195_s2 = inlined_call_operand.vmem [shape: f32[1,128], index: 2, kind: input, shape index: {}]   ;;  %s196_s3 = inlined_call_operand.vmem [shape: bf16[16,128], index: 3, kind: output, shape index: {}]  }
   0x1   :  { %139 = vmatprep.subr.bf16.mxu0 %v156_v0  ;;  %v149_v1 = vld [vmem:[%s193_s1] sm:$0xff]   ;;  %143 = vmatprep.mubr.msk.bf16.mxu0 %vm157_vm0, %v156_v0  ;;  %v150_v2 = vld [vmem:[%s193_s1 + $0x8] sm:$0xff]  }
   0x2   :  { %140 = vmatpush3.bf16.msra.mxu0 %v149_v1  ;;  %v151_v3 = vld [vmem:[%s194_s0] sm:$0xff]  }
   0x3   :  { %141 = vmatprep.subr.bf16.mxu0 %v156_v0  ;;  %v122_v4 = vld [vmem:[%s195_s2] ss:$0 sm:$0xff] }
   0x6   :  { %142 = vmatpush3.bf16.msra.mxu0 %v150_v2 }
   0x9   :  { %144 = vmatmul.mubr.msk.bf16.vlgmr.msra.gmra.mrb[0].mxu0 %vm45_vm1, %v151_v3 }
  0xdc   :  { %v83_v5 = vpop.f32.mrb[0].mxu0 }
  0xdd   :  { %v84_v6 = vadd.f32 %v122_v4, %v83_v5  ;;  %v145_v7 = vpop.f32.mrb[1].mxu0 }
  0xde   :  { %v86_v8 = vpop.f32.mrb[2].mxu0 }
  0xdf   :  { %v92_v9 = vmul.f32 0.044715, %v84_v6  ;;  %v87_v10 = vadd.f32 %v122_v4, %v86_v8  ;;  %v146_v11 = vpop.f32.mrb[3].mxu0  ;;  %v90_v24 = vmul.f32 0.5, %v84_v6 }
  0xe1   :  { %v94_v12 = vmul.f32 %v92_v9, %v84_v6  ;;  %v93_v13 = vmul.f32 0.044715, %v87_v10  ;;  %v91_v25 = vmul.f32 0.5, %v87_v10 }
  0xe3   :  { %v96_v14 = vmul.f32 %v94_v12, %v84_v6  ;;  %v95_v15 = vmul.f32 %v93_v13, %v87_v10 }
  0xe5   :  { %v98_v16 = vadd.f32 %v96_v14, %v84_v6  ;;  %v97_v17 = vmul.f32 %v95_v15, %v87_v10 }
  0xe7   :  { %v100_v18 = vmul.f32 0.7978846, %v98_v16  ;;  %v99_v19 = vadd.f32 %v97_v17, %v87_v10 }
  0xe9   :  { %152 = vtanh.f32 %v100_v18  ;;  %v101_v20 = vmul.f32 0.7978846, %v99_v19 }
  0xeb   :  { %154 = vtanh.f32 %v101_v20 }
  0xf3   :  { %v153_v21 = vpop.eup %152 }
  0xf4   :  { %v104_v22 = vadd.f32 1.0, %v153_v21 }
  0xf5   :  { %v155_v23 = vpop.eup %154 }
  0xf6   :  { %v105_v26 = vadd.f32 1.0, %v155_v23  ;;  %v106_v27 = vmul.f32 %v104_v22, %v90_v24 }
  0xf8   :  { %v107_v28 = vmul.f32 %v105_v26, %v91_v25 }
  0xfa   :  { %v134_v29 = vpack.c.bf16 %v107_v28, %v106_v27 }
  0xfc   :  { %135 = vst [vmem:[%s196_s3] sm:$0xff] %v134_v29  }

// kernel: bert_classifier_forward.17
= control target key start
LH: loop header
LB: loop body
LE: loop exit
PB: predicated region body
PF: predicated region fallthrough
CT: control target
= control target key end

     0   :  { %v275_v0 = vmov 0.0   ;;  %vm276_vm0 = vmmov 0   ;;  %vm150_vm1 = vcmask 261120   ;;  %vm204_vm2 = vcmask 257024   ;;  %s361_s1 = inlined_call_operand.vmem [shape: bf16[128,32], index: 1, kind: input, shape index: {}]   ;;  %s362_s0 = inlined_call_operand.vmem [shape: bf16[16,128], index: 0, kind: input, shape index: {}]   ;;  %s363_s3 = inlined_call_operand.vmem [shape: bf16[16,32], index: 3, kind: input, shape index: {}]   ;;  %s364_s2 = inlined_call_operand.vmem [shape: f32[1,32], index: 2, kind: input, shape index: {}]   ;;  %s365_s4 = inlined_call_operand.vmem [shape: f32[1,32], index: 4, kind: input, shape index: {}]   ;;  %s366_s5 = inlined_call_operand.vmem [shape: f32[1,32], index: 5, kind: input, shape index: {}]   ;;  %s367_s6 = inlined_call_operand.vmem [shape: bf16[16,32], index: 6, kind: output, shape index: {}]  }
   0x1   :  { %240 = vmatprep.subr.bf16.mxu0 %v275_v0  ;;  %v262_v1 = vld [vmem:[%s361_s1] sm:$0xff]   ;;  %256 = vmatprep.mubr.msk.bf16.mxu0 %vm276_vm0, %v275_v0  ;;  %v263_v2 = vld [vmem:[%s361_s1 + $0x8] sm:$0xff]   ;;  %v264_v3 = vld [vmem:[%s361_s1 + $0x10] sm:$0xff]  }
   0x2   :  { %241 = vmatpush3.bf16.msra.mxu0 %v262_v1  ;;  %v265_v4 = vld [vmem:[%s361_s1 + $0x18] sm:$0xff]   ;;  %v266_v5 = vld [vmem:[%s361_s1 + $0x20] sm:$0xff]   ;;  %v267_v6 = vld [vmem:[%s361_s1 + $0x28] sm:$0xff]  }
   0x3   :  { %242 = vmatprep.subr.bf16.mxu0 %v275_v0  ;;  %v268_v7 = vld [vmem:[%s361_s1 + $0x30] sm:$0xff]   ;;  %v269_v8 = vld [vmem:[%s361_s1 + $0x38] sm:$0xff]   ;;  %v270_v9 = vld [vmem:[%s362_s0] sm:$0xff]  }
   0x4   :  { %v228_v10 = vld [vmem:[%s363_s3] sm:$0xff]  }
   0x5   :  { %v211_v11 = vld [vmem:[%s364_s2] ss:$0 sm:$0xff]  ;;  %v229_v12 = vunpack.c.l.bf16 %v228_v10  ;;  %v230_v16 = vunpack.c.h.bf16 %v228_v10 }
   0x6   :  { %243 = vmatpush3.bf16.msra.mxu0 %v263_v2  ;;  %v221_v41 = vld [vmem:[%s365_s4] ss:$0 sm:$0xff] }
   0x7   :  { %244 = vmatprep.subr.bf16.mxu0 %v275_v0  ;;  %v222_v43 = vld [vmem:[%s366_s5] ss:$0 sm:$0xff] }
   0xa   :  { %245 = vmatpush3.bf16.msra.mxu0 %v264_v3 }
   0xb   :  { %246 = vmatprep.subr.bf16.mxu0 %v275_v0 }
   0xe   :  { %247 = vmatpush3.bf16.msra.mxu0 %v265_v4 }
   0xf   :  { %248 = vmatprep.subr.bf16.mxu0 %v275_v0 }
  0x12   :  { %249 = vmatpush3.bf16.msra.mxu0 %v266_v5 }
  0x13   :  { %250 = vmatprep.subr.bf16.mxu0 %v275_v0 }
  0x16   :  { %251 = vmatpush3.bf16.msra.mxu0 %v267_v6 }
  0x17   :  { %252 = vmatprep.subr.bf16.mxu0 %v275_v0 }
  0x1a   :  { %253 = vmatpush3.bf16.msra.mxu0 %v268_v7 }
  0x1b   :  { %254 = vmatprep.subr.bf16.mxu0 %v275_v0 }
  0x1e   :  { %255 = vmatpush3.bf16.msra.mxu0 %v269_v8 }
  0x21   :  { %257 = vmatmul.mubr.bf16.vlgmr.msra.gmra.mrb[0].mxu0 %v270_v9 }
  0xf4   :  { %v137_v13 = vpop.f32.mrb[0].mxu0 }
  0xf5   :  { %v138_v14 = vadd.f32 %v211_v11, %v137_v13  ;;  %v258_v15 = vpop.f32.mrb[1].mxu0 }
  0xf6   :  { %v140_v17 = vpop.f32.mrb[2].mxu0 }
  0xf7   :  { %v141_v18 = vadd.f32 %v211_v11, %v140_v17  ;;  %v259_v19 = vpop.f32.mrb[3].mxu0  ;;  %v148_v20 = vadd.f32 %v229_v12, %v138_v14 }
  0xf9   :  { %v151_v21 = vsel %vm150_vm1, %v148_v20, 0.0  ;;  %v149_v22 = vadd.f32 %v230_v16, %v141_v18 }
  0xfa   :  { %152 = vadd.xlane.f32.xlu0 %v151_v21 }
  0xfb   :  { %v154_v23 = vsel %vm150_vm1, %v149_v22, 0.0 }
  0xfe   :  { %155 = vadd.xlane.f32.xlu0 %v154_v23 }
 0x187   :  { %v153_v24 = vpop.xlane.xlu0 %152 }
 0x188   :  { %v158_v25 = vmul.f32 0.03125, %v153_v24 }
 0x18a   :  { %v160_v26 = vsub.f32 %v148_v20, %v158_v25 }
 0x18b   :  { %v156_v27 = vpop.xlane.xlu0 %155 }
 0x18c   :  { %v159_v28 = vmul.f32 0.03125, %v156_v27  ;;  %v162_v29 = vmul.f32 %v160_v26, %v160_v26 }
 0x18e   :  { %v161_v30 = vsub.f32 %v149_v22, %v159_v28  ;;  %v164_v31 = vsel %vm150_vm1, %v162_v29, 0.0 }
 0x18f   :  { %165 = vadd.xlane.f32.xlu1 %v164_v31 }
 0x190   :  { %v163_v32 = vmul.f32 %v161_v30, %v161_v30 }
 0x192   :  { %v167_v33 = vsel %vm150_vm1, %v163_v32, 0.0 }
 0x193   :  { %168 = vadd.xlane.f32.xlu1 %v167_v33 }
 0x21c   :  { %v166_v34 = vpop.xlane.xlu1 %165 }
 0x21d   :  { %v170_v35 = vmul.f32 0.03125, %v166_v34 }
 0x21f   :  { %v172_v36 = vadd.f32 1e-12, %v170_v35 }
 0x220   :  { %v169_v37 = vpop.xlane.xlu1 %168 }
 0x221   :  { %271 = vrsqrt.f32 %v172_v36  ;;  %v171_v38 = vmul.f32 0.03125, %v169_v37 }
 0x223   :  { %v173_v39 = vadd.f32 1e-12, %v171_v38 }
 0x225   :  { %273 = vrsqrt.f32 %v173_v39 }
 0x22b   :  { %v272_v40 = vpop.eup %271 }
 0x22c   :  { %v176_v42 = vmul.f32 %v272_v40, %v160_v26 }
 0x22e   :  { %v185_v44 = vmul.f32 %v221_v41, %v176_v42 }
 0x22f   :  { %v274_v45 = vpop.eup %273 }
 0x230   :  { %v194_v46 = vadd.f32 %v222_v43, %v185_v44  ;;  %v177_v47 = vmul.f32 %v274_v45, %v161_v30 }
 0x232   :  { %v225_v48 = vpack.c.bf16 %v194_v46, %v194_v46  ;;  %v186_v49 = vmul.f32 %v221_v41, %v177_v47 }
 0x234   :  { %205 = vst.msk [vmem:[%s367_s6] sm:$0xf] %vm204_vm2, %v225_v48  ;;  %v195_v50 = vadd.f32 %v222_v43, %v186_v49 }
 0x236   :  { %v226_v51 = vpack.c.bf16 %v195_v50, %v195_v50 }
 0x238   :  { %206 = vst.msk [vmem:[%s367_s6 + $0x4] sm:$0xf] %vm204_vm2, %v226_v51 }

// kernel: bert_classifier_forward.23
= control target key start
LH: loop header
LB: loop body
LE: loop exit
PB: predicated region body
PF: predicated region fallthrough
CT: control target
= control target key end

     0   :  { %v237_v1 = vmov 0.0   ;;  %vm238_vm0 = vmmov 0   ;;  %s305_s0 = inlined_call_operand.vmem [shape: bf16[2,32], index: 0, kind: input, shape index: {}]   ;;  %s306_s1 = inlined_call_operand.vmem [shape: bf16[32,32], index: 1, kind: input, shape index: {}]   ;;  %s307_s2 = inlined_call_operand.vmem [shape: f32[1,32], index: 2, kind: input, shape index: {}]   ;;  %s308_s3 = inlined_call_operand.vmem [shape: bf16[32,3], index: 3, kind: input, shape index: {}]   ;;  %s309_s4 = inlined_call_operand.vmem [shape: f32[1,3], index: 4, kind: input, shape index: {}]   ;;  %s310_s5 = inlined_call_operand.hbm [shape: f32[2,3], index: 5, kind: output, shape index: {}]  }
   0x1   :  { %v207_v0 = vld [vmem:[%s306_s1] sm:$0xff]   ;;  %188 = vmatprep.subr.bf16.mxu0 %v237_v1  ;;  %196 = vmatprep.subr.bf16.mxu1 %v237_v1  ;;  %v208_v2 = vld [vmem:[%s306_s1 + $0x8] sm:$0xff]  }
   0x2   :  { %189 = vmatpush3.bf16.msra.mxu0 %v207_v0  ;;  %192 = vmatprep.mubr.msk.bf16.mxu0 %vm238_vm0, %v237_v1 }
   0x3   :  { %190 = vmatprep.subr.bf16.mxu0 %v237_v1  ;;  %200 = vmatprep.mubr.msk.bf16.mxu1 %vm238_vm0, %v237_v1 }
   0x4   :  { %10 = vsyncpa [#allocation3], 0  ;;  %v22_v3 = vld [vmem:[%s305_s0] sm:$0x1]  ;;  %vm46_vm1 = vcmask 261120   ;;  %v210_v5 = vld [vmem:[%s308_s3 + $0x8] sm:$0xff]  }
   0x5   :  { %v209_v4 = vld [vmem:[%s308_s3] sm:$0xff]   ;;  %s239_s3 = smov [#allocation2]   ;;  %vm158_vm2 = vcmask 17408  }
   0x6   :  { %191 = vmatpush3.bf16.msra.mxu0 %v208_v2  ;;  %197 = vmatpush3.bf16.msra.mxu1 %v209_v4  ;;  %v174_v6 = vld [vmem:[%s307_s2] ss:$0 sm:$0xff]  ;;  %s166_s30 = sshll.u32 %s239_s3, 4  ;;  %s167_s30 = int_to_ptr.vmem [resolvable:$true] %s166_s30 }
   0x7   :  { %198 = vmatprep.subr.bf16.mxu1 %v237_v1  ;;  %v178_v14 = vld [vmem:[%s309_s4] ss:$0 sm:$0xff]  ;;  %s213_s2 = scalar_lea.vmem %s167_s30, 32  ;;  %p218_p1 = scmp.lt.s32.totalorder %s167_s30, %s167_s30 }
   0x8   :  { %p214_p0 = scmp.ne.s32.totalorder %s167_s30, %s213_s2  ;;  %p219_p2 = scmp.lt.s32.totalorder %s213_s2, %s213_s2 }
   0x9   :  { %193 = vmatmul.mubr.msk.bf16.vlgmr.msra.gmra.mrb[0].mxu0 %vm46_vm1, %v22_v3 }
   0xa   :  { %199 = vmatpush3.bf16.msra.mxu1 %v210_v5  ;;  %p220_p3 = por %p219_p2, %p218_p1 }
   0xc   :  { %p221_p4 = pnand %p220_p3, %p214_p0 }
  0xdc   :  { %v84_v7 = vpop.f32.mrb[0].mxu0 }
  0xdd   :  { %v85_v8 = vadd.f32 %v174_v6, %v84_v7  ;;  %v194_v9 = vpop.f32.mrb[1].mxu0 }
  0xde   :  { %v87_v10 = vpop.f32.mrb[2].mxu0 }
  0xdf   :  { %211 = vtanh.f32 %v85_v8  ;;  %v195_v11 = vpop.f32.mrb[3].mxu0 }
  0xe9   :  { %v212_v12 = vpop.eup %211 }
  0xea   :  { %v91_v13 = vpack.c.bf16 %v212_v12, %v212_v12 }
  0xec   :  { %201 = vmatmul.mubr.msk.bf16.vlgmr.msra.gmra.mrb[0].mxu1 %vm46_vm1, %v91_v13 }
 0x1bf   :  { %v152_v15 = vpop.f32.mrb[0].mxu1 }
 0x1c0   :  { %v153_v16 = vadd.f32 %v178_v14, %v152_v15  ;;  %v202_v17 = vpop.f32.mrb[1].mxu1 }
 0x1c1   :  { %v155_v18 = vpop.f32.mrb[2].mxu1 }
 0x1c2   :  { %v203_v19 = vpop.f32.mrb[3].mxu1  ;;  %159 = vst.msk [vmem:[#allocation2] sm:$0x3] %vm158_vm2, %v153_v16 }
 0x1c3   :  { %224 = shalt.err (!%p221_p4)
}
 0x1c4   :  { %s225_s4 = scalar_lea.hbm %s310_s5, 32 }
 0x1c5   :  { %p226_p5 = scmp.ne.s32.totalorder %s310_s5, %s225_s4  ;;  %p229_p6 = scmp.lt.u32.totalorder %s225_s4, %s310_s5 }
 0x1c7   :  { %p231_p7 = pnand %p229_p6, %p226_p5 }
 0x1c9   :  { %234 = shalt.err (!%p231_p7)
}
 0x1ca   :  { %169 = dma.vmem_to_hbm [thread:$0]  %s167_s30, 32, %s310_s5, [#allocation3]  }
 0x1cb   :  { %235 = dma.done.wait [#allocation3], 32  }
 0x1cc   :  { %236 = vsyncadd [#allocation3], 4294967264 }
 0x1cd   :  { %173 = vsyncpa [#allocation3], 1 }

</bundles_post_ra>
